<compile_context>
chip_gen: v7x
topology: tpu7x:2x2x1
jax: 0.10.0
libtpu: 0.0.40
codegen_flags: <defaults>
</compile_context>

<pallas_src>
import jax
import jax.numpy as jnp
from jax.experimental import pallas as pl
from jax.experimental.pallas import tpu as pltpu

WIDTH = 16
HEIGHT = 16
CHANNELS = 3
NUM_CATEGORIES = 10
HIDDEN = 512
IN_FEATURES = WIDTH * HEIGHT * CHANNELS  # 768
N_PAD = 128                              # lane-dense padded last-layer width


def _round_up(x, m):
    return ((x + m - 1) // m) * m


def _default_mid_dtype():
    """bf16 bias/ReLU intermediates on chips with a bf16 VPU (v6e/v7x),
    f32 otherwise (v5e and older). f32 is always a correct fallback."""
    try:
        kind = jax.devices()[0].device_kind.lower()
    except Exception:
        return jnp.float32
    if "v6" in kind or "v7" in kind:
        return jnp.bfloat16
    return jnp.float32


def _pick_batch_tiling(B):
    """Return (TM, B_pad): TM is a multiple of 16; for medium/large batches we
    keep grid_b = B_pad // TM >= 2 so v7x megacore can shard the batch axis."""
    if B <= 256:
        TM = max(_round_up(B, 16), 16)      # single tile for small batches
        return TM, TM
    if B <= 1024:
        TM = _round_up((B + 1) // 2, 16)    # two tiles -> grid_b == 2
        return TM, 2 * TM
    TM = 512                                # large batch: 512-row tiles
    return TM, _round_up(B, TM)


def make_mlp_kernel(mid_dtype):
    def mlp_kernel(x_ref, w1_ref, b1_ref, w2_ref, b2_ref, w3_ref, b3_ref, o_ref):
        # In-kernel cast: x arrives f32 from HBM, cast to bf16 on the VPU
        # (free slot next to the MXU), avoiding a wrapper-side cast pass.
        x = x_ref[...].astype(jnp.bfloat16)

        # Layer 1: bf16 MXU matmul, f32 accumulate; bias+ReLU in mid_dtype.
        h1 = jnp.dot(x, w1_ref[...], preferred_element_type=jnp.float32)
        h1 = jnp.maximum(h1.astype(mid_dtype) + b1_ref[...], 0).astype(jnp.bfloat16)

        # Layer 2
        h2 = jnp.dot(h1, w2_ref[...], preferred_element_type=jnp.float32)
        h2 = jnp.maximum(h2.astype(mid_dtype) + b2_ref[...], 0).astype(jnp.bfloat16)

        # Layer 3 (output padded to 128 lanes; padded columns are zero weight/bias
        # so the final store is a full unmasked 128-lane vst).
        logits = jnp.dot(h2, w3_ref[...], preferred_element_type=jnp.float32)
        o_ref[...] = (logits + b3_ref[...]).astype(o_ref.dtype)

    return mlp_kernel


def prepare_params(params, mid_dtype=None):
    """One-time weight preprocessing (hoisted out of the per-call forward):
    bf16 MXU operands, lane-dense zero-padding of the final layer."""
    if mid_dtype is None:
        mid_dtype = _default_mid_dtype()
    w1, b1, w2, b2, w3, b3 = params
    w1_b = w1.astype(jnp.bfloat16)
    w2_b = w2.astype(jnp.bfloat16)
    w3_p = jnp.pad(w3, ((0, 0), (0, N_PAD - NUM_CATEGORIES))).astype(jnp.bfloat16)
    b1_m = b1.astype(mid_dtype)
    b2_m = b2.astype(mid_dtype)
    b3_p = jnp.pad(b3, ((0, 0), (0, N_PAD - NUM_CATEGORIES)))  # stays f32
    return (w1_b, b1_m, w2_b, b2_m, w3_p, b3_p), mid_dtype


def neural_network_forward(x_nchw, prepared_params, mid_dtype):
    """x_nchw: (B, C, H, W) float32. Returns logits (B, NUM_CATEGORIES) f32."""
    w1_b, b1_m, w2_b, b2_m, w3_p, b3_p = prepared_params
    B = x_nchw.shape[0]

    # nn.Flatten(): (B, C, H, W) -> (B, C*H*W), channel-major (row-major reshape).
    x_flat = x_nchw.reshape(B, IN_FEATURES)   # stays f32; cast happens in-kernel

    TM, B_pad = _pick_batch_tiling(B)
    if B_pad != B:
        x_flat = jnp.pad(x_flat, ((0, B_pad - B), (0, 0)))
    grid_b = B_pad // TM

    # Weights/biases: constant block index -> fetched once, VMEM-resident
    # across batch-grid steps.
    resident = lambda shape: pl.BlockSpec(shape, lambda i: (0, 0))

    flops = 2 * B_pad * (IN_FEATURES * HIDDEN + HIDDEN * HIDDEN + HIDDEN * N_PAD)
    bytes_accessed = (
        x_flat.size * 4                              # f32 input
        + (w1_b.size + w2_b.size + w3_p.size) * 2    # bf16 weights
        + (b1_m.size + b2_m.size) * b1_m.dtype.itemsize
        + b3_p.size * 4                              # f32 final bias
        + B_pad * N_PAD * 4                          # f32 output
    )

    out_padded = pl.pallas_call(
        make_mlp_kernel(mid_dtype),
        out_shape=jax.ShapeDtypeStruct((B_pad, N_PAD), jnp.float32),
        grid_spec=pltpu.PrefetchScalarGridSpec(
            num_scalar_prefetch=0,
            grid=(grid_b,),
            in_specs=[
                pl.BlockSpec((TM, IN_FEATURES), lambda i: (i, 0)),  # x tile (f32)
                resident(w1_b.shape), resident(b1_m.shape),
                resident(w2_b.shape), resident(b2_m.shape),
                resident(w3_p.shape), resident(b3_p.shape),
            ],
            out_specs=pl.BlockSpec((TM, N_PAD), lambda i: (i, 0)),
        ),
        compiler_params=pltpu.CompilerParams(
            dimension_semantics=("parallel",),
            vmem_limit_bytes=32 << 20,
        ),
        cost_estimate=pl.CostEstimate(
            flops=flops, transcendentals=0, bytes_accessed=bytes_accessed),
    )(x_flat, w1_b, b1_m, w2_b, b2_m, w3_p, b3_p)

    return out_padded[:B, :NUM_CATEGORIES]


def init_params(key):
    """Deterministic init mimicking PyTorch nn.Linear defaults:
    U(-1/sqrt(fan_in), 1/sqrt(fan_in)) for both weight and bias."""
    def linear(key, fan_in, fan_out):
        kw, kb = jax.random.split(key)
        bound = 1.0 / jnp.sqrt(jnp.float32(fan_in))
        # Stored as (fan_in, fan_out) so the kernel computes x @ W (== x @ W_torch.T)
        w = jax.random.uniform(kw, (fan_in, fan_out), jnp.float32, -bound, bound)
        b = jax.random.uniform(kb, (1, fan_out), jnp.float32, -bound, bound)
        return w, b

    k1, k2, k3 = jax.random.split(key, 3)
    w1, b1 = linear(k1, IN_FEATURES, HIDDEN)
    w2, b2 = linear(k2, HIDDEN, HIDDEN)
    w3, b3 = linear(k3, HIDDEN, NUM_CATEGORIES)
    return (w1, b1, w2, b2, w3, b3)


def reference_forward(x_nchw, params):
    """Pure-JAX f32 reference matching the PyTorch module."""
    w1, b1, w2, b2, w3, b3 = params
    x = x_nchw.reshape(x_nchw.shape[0], -1)
    h1 = jnp.maximum(x @ w1 + b1, 0.0)
    h2 = jnp.maximum(h1 @ w2 + b2, 0.0)
    return h2 @ w3 + b3


if __name__ == "__main__":
    key = jax.random.PRNGKey(0)
    kp, kx1, kx2 = jax.random.split(key, 3)
    params = init_params(kp)
    prepared, mid_dtype = prepare_params(params)

    # Case 1: tiny batch (single tile, pad 2 -> 16 rows).
    B1 = 2
    x1 = jax.random.normal(kx1, (B1, CHANNELS, HEIGHT, WIDTH), jnp.float32)
    out1 = jax.block_until_ready(neural_network_forward(x1, prepared, mid_dtype))
    ref1 = reference_forward(x1, params)
    assert out1.shape == (B1, NUM_CATEGORIES)
    assert jnp.allclose(out1, ref1, atol=5e-2, rtol=5e-2), "mismatch vs reference (B=2)"

    # Case 2: non-multiple-of-tile batch that exercises pad/slice and grid_b=2.
    B2 = 272
    x2 = jax.random.normal(kx2, (B2, CHANNELS, HEIGHT, WIDTH), jnp.float32)
    out2 = jax.block_until_ready(neural_network_forward(x2, prepared, mid_dtype))
    ref2 = reference_forward(x2, params)
    assert out2.shape == (B2, NUM_CATEGORIES)
    assert jnp.allclose(out2, ref2, atol=5e-2, rtol=5e-2), "mismatch vs reference (B=272)"

    print("KERNEL_OK")
</pallas_src>

<mosaic_0001>
module attributes {stable_mosaic.version = 11 : i64} {
  func.func @mlp_kernel(%arg0: i32, %arg1: memref<16x768xf32, #tpu.memory_space<vmem>>, %arg2: memref<768x512xbf16, #tpu.memory_space<vmem>>, %arg3: memref<1x512xf32, #tpu.memory_space<vmem>>, %arg4: memref<512x512xbf16, #tpu.memory_space<vmem>>, %arg5: memref<1x512xf32, #tpu.memory_space<vmem>>, %arg6: memref<512x128xbf16, #tpu.memory_space<vmem>>, %arg7: memref<1x128xf32, #tpu.memory_space<vmem>>, %arg8: memref<16x128xf32, #tpu.memory_space<vmem>>) attributes {dimension_semantics = [#tpu.dimension_semantics<parallel>], iteration_bounds = array<i64: 1>, scalar_prefetch = 0 : i64, scratch_operands = 0 : i64, tpu.core_type = #tpu.core_type<tc>, window_params = [{transform_indices = @transform_0, window_bounds = array<i64: 16, 768>}, {pipeline_mode = #tpu.pipeline_mode<synchronous>, transform_indices = @transform_1, window_bounds = array<i64: 768, 512>}, {pipeline_mode = #tpu.pipeline_mode<synchronous>, transform_indices = @transform_2, window_bounds = array<i64: 1, 512>}, {pipeline_mode = #tpu.pipeline_mode<synchronous>, transform_indices = @transform_3, window_bounds = array<i64: 512, 512>}, {pipeline_mode = #tpu.pipeline_mode<synchronous>, transform_indices = @transform_4, window_bounds = array<i64: 1, 512>}, {pipeline_mode = #tpu.pipeline_mode<synchronous>, transform_indices = @transform_5, window_bounds = array<i64: 512, 128>}, {pipeline_mode = #tpu.pipeline_mode<synchronous>, transform_indices = @transform_6, window_bounds = array<i64: 1, 128>}, {transform_indices = @transform_7, window_bounds = array<i64: 16, 128>}]} {
    %c0 = arith.constant 0 : index
    %c0_0 = arith.constant 0 : index
    %0 = vector.load %arg1[%c0, %c0_0] : memref<16x768xf32, #tpu.memory_space<vmem>>, vector<16x768xf32>
    %1 = arith.truncf %0 : vector<16x768xf32> to vector<16x768xbf16>
    %c0_1 = arith.constant 0 : index
    %c0_2 = arith.constant 0 : index
    %2 = vector.load %arg2[%c0_1, %c0_2] : memref<768x512xbf16, #tpu.memory_space<vmem>>, vector<768x512xbf16>
    %cst = arith.constant dense<0.000000e+00> : vector<16x512xf32>
    %3 = tpu.matmul %1, %2, %cst {dimension_numbers = #tpu.dot_dimension_numbers<[1], [0], [0], [1], [0, 0, 1, 1], [], []>} : vector<16x768xbf16>, vector<768x512xbf16>, vector<16x512xf32> -> vector<16x512xf32>
    %c0_3 = arith.constant 0 : index
    %c0_4 = arith.constant 0 : index
    %4 = vector.load %arg3[%c0_3, %c0_4] : memref<1x512xf32, #tpu.memory_space<vmem>>, vector<1x512xf32>
    %5 = vector.broadcast %4 : vector<1x512xf32> to vector<16x512xf32>
    %6 = arith.addf %3, %5 : vector<16x512xf32>
    %cst_5 = arith.constant 0.000000e+00 : f32
    %7 = vector.broadcast %cst_5 : f32 to vector<16x512xf32>
    %8 = arith.maximumf %6, %7 : vector<16x512xf32>
    %9 = arith.truncf %8 : vector<16x512xf32> to vector<16x512xbf16>
    %c0_6 = arith.constant 0 : index
    %c0_7 = arith.constant 0 : index
    %10 = vector.load %arg4[%c0_6, %c0_7] : memref<512x512xbf16, #tpu.memory_space<vmem>>, vector<512x512xbf16>
    %cst_8 = arith.constant dense<0.000000e+00> : vector<16x512xf32>
    %11 = tpu.matmul %9, %10, %cst_8 {dimension_numbers = #tpu.dot_dimension_numbers<[1], [0], [0], [1], [0, 0, 1, 1], [], []>} : vector<16x512xbf16>, vector<512x512xbf16>, vector<16x512xf32> -> vector<16x512xf32>
    %c0_9 = arith.constant 0 : index
    %c0_10 = arith.constant 0 : index
    %12 = vector.load %arg5[%c0_9, %c0_10] : memref<1x512xf32, #tpu.memory_space<vmem>>, vector<1x512xf32>
    %13 = vector.broadcast %12 : vector<1x512xf32> to vector<16x512xf32>
    %14 = arith.addf %11, %13 : vector<16x512xf32>
    %cst_11 = arith.constant 0.000000e+00 : f32
    %15 = vector.broadcast %cst_11 : f32 to vector<16x512xf32>
    %16 = arith.maximumf %14, %15 : vector<16x512xf32>
    %17 = arith.truncf %16 : vector<16x512xf32> to vector<16x512xbf16>
    %c0_12 = arith.constant 0 : index
    %c0_13 = arith.constant 0 : index
    %18 = vector.load %arg6[%c0_12, %c0_13] : memref<512x128xbf16, #tpu.memory_space<vmem>>, vector<512x128xbf16>
    %cst_14 = arith.constant dense<0.000000e+00> : vector<16x128xf32>
    %19 = tpu.matmul %17, %18, %cst_14 {dimension_numbers = #tpu.dot_dimension_numbers<[1], [0], [0], [1], [0, 0, 1, 1], [], []>} : vector<16x512xbf16>, vector<512x128xbf16>, vector<16x128xf32> -> vector<16x128xf32>
    %c0_15 = arith.constant 0 : index
    %c0_16 = arith.constant 0 : index
    %20 = vector.load %arg7[%c0_15, %c0_16] : memref<1x128xf32, #tpu.memory_space<vmem>>, vector<1x128xf32>
    %21 = vector.broadcast %20 : vector<1x128xf32> to vector<16x128xf32>
    %22 = arith.addf %19, %21 : vector<16x128xf32>
    %c0_17 = arith.constant 0 : index
    %c0_18 = arith.constant 0 : index
    %23 = vector.load %arg8[%c0_17, %c0_18] : memref<16x128xf32, #tpu.memory_space<vmem>>, vector<16x128xf32>
    tpu.vector_store %arg8[%c0_17, %c0_18], %22 {strides = array<i32>} : memref<16x128xf32, #tpu.memory_space<vmem>>, vector<16x128xf32>,
    return
  }
  func.func @transform_0(%arg0: i32) -> (i32, i32) {
    %c0_i32 = arith.constant 0 : i32
    %c0_i32_0 = arith.constant 0 : i32
    return %arg0, %c0_i32 : i32, i32
  }
  func.func @transform_1(%arg0: i32) -> (i32, i32) {
    %c0_i32 = arith.constant 0 : i32
    %c0_i32_0 = arith.constant 0 : i32
    %c0_i32_1 = arith.constant 0 : i32
    return %c0_i32, %c0_i32_0 : i32, i32
  }
  func.func @transform_2(%arg0: i32) -> (i32, i32) {
    %c0_i32 = arith.constant 0 : i32
    %c0_i32_0 = arith.constant 0 : i32
    %c0_i32_1 = arith.constant 0 : i32
    return %c0_i32, %c0_i32_0 : i32, i32
  }
  func.func @transform_3(%arg0: i32) -> (i32, i32) {
    %c0_i32 = arith.constant 0 : i32
    %c0_i32_0 = arith.constant 0 : i32
    %c0_i32_1 = arith.constant 0 : i32
    return %c0_i32, %c0_i32_0 : i32, i32
  }
  func.func @transform_4(%arg0: i32) -> (i32, i32) {
    %c0_i32 = arith.constant 0 : i32
    %c0_i32_0 = arith.constant 0 : i32
    %c0_i32_1 = arith.constant 0 : i32
    return %c0_i32, %c0_i32_0 : i32, i32
  }
  func.func @transform_5(%arg0: i32) -> (i32, i32) {
    %c0_i32 = arith.constant 0 : i32
    %c0_i32_0 = arith.constant 0 : i32
    %c0_i32_1 = arith.constant 0 : i32
    return %c0_i32, %c0_i32_0 : i32, i32
  }
  func.func @transform_6(%arg0: i32) -> (i32, i32) {
    %c0_i32 = arith.constant 0 : i32
    %c0_i32_0 = arith.constant 0 : i32
    %c0_i32_1 = arith.constant 0 : i32
    return %c0_i32, %c0_i32_0 : i32, i32
  }
  func.func @transform_7(%arg0: i32) -> (i32, i32) {
    %c0_i32 = arith.constant 0 : i32
    %c0_i32_0 = arith.constant 0 : i32
    return %arg0, %c0_i32 : i32, i32
  }
}

</mosaic_0001>

<bundles_post_ra>
// kernel: tpu_custom_call.1
= control target key start
LH: loop header
LB: loop body
LE: loop exit
PB: predicated region body
PF: predicated region fallthrough
CT: control target
= control target key end

     0   :  { %12 = vsyncpa [#allocation3], 0  ;;  %s4126_s0 = inlined_call_operand.hbm [shape: f32[16,768], index: 0, kind: input, shape index: {}]   ;;  %s4127_s1 = inlined_call_operand.hbm [shape: bf16[768,512], index: 1, kind: input, shape index: {}]   ;;  %s4128_s2 = inlined_call_operand.vmem [shape: f32[1,512], index: 2, kind: input, shape index: {}]   ;;  %s4129_s3 = inlined_call_operand.hbm [shape: bf16[512,512], index: 3, kind: input, shape index: {}]   ;;  %s4130_s4 = inlined_call_operand.vmem [shape: f32[1,512], index: 4, kind: input, shape index: {}]   ;;  %s4131_s5 = inlined_call_operand.hbm [shape: bf16[512,128], index: 5, kind: input, shape index: {}]   ;;  %s4132_s6 = inlined_call_operand.vmem [shape: f32[1,128], index: 6, kind: input, shape index: {}]   ;;  %s4133_s7 = inlined_call_operand.hbm [shape: f32[16,128], index: 7, kind: output, shape index: {}]  }
   0x1   :  { %13 = vsyncpa [#allocation6], 0 }
   0x2   :  { %14 = vsyncpa [#allocation9], 0 }
   0x3   :  { %15 = vsyncpa [#allocation4], 0  ;;  %s3965_s24 = smov [#allocation5]   ;;  %s3847_s28 = scalar_lea.hbm %s4127_s1, 24576 }
   0x4   :  { %s33_s25 = sshll.u32 %s3965_s24, 4  ;;  %p3848_p0 = scmp.ne.s32.totalorder %s4127_s1, %s3847_s28  ;;  %s34_s25 = int_to_ptr.vmem [resolvable:$true] %s33_s25 }
   0x5   :  { %p3851_p1 = scmp.lt.u32.totalorder %s3847_s28, %s4127_s1 }
   0x7   :  { %p3853_p2 = pnand %p3851_p1, %p3848_p0 }
   0x9   :  { %3856 = shalt.err (!%p3853_p2)
}
   0xa   :  { %s3857_s10 = scalar_lea.vmem %s34_s25, 24576  ;;  %p3862_p4 = scmp.lt.s32.totalorder %s34_s25, %s34_s25 }
   0xb   :  { %p3858_p3 = scmp.ne.s32.totalorder %s34_s25, %s3857_s10  ;;  %p3863_p5 = scmp.lt.s32.totalorder %s3857_s10, %s3857_s10 }
   0xd   :  { %p3864_p6 = por %p3863_p5, %p3862_p4 }
   0xf   :  { %p3865_p7 = pnand %p3864_p6, %p3858_p3 }
  0x11   :  { %3868 = shalt.err (!%p3865_p7)
}
  0x12   :  { %s3966_s11 = smov 256   ;;  %s3967_s12 = smov 16  }
  0x13   :  { %39 = dma.hbm_to_vmem [thread:$0]  %s4127_s1, 24576, %s34_s25, [#allocation6], %s3966_s11, %s3966_s11, %s3967_s12  }
  0x14   :  { %s3968_s15 = smov [#allocation2]   ;;  %s3869_s19 = scalar_lea.hbm %s4126_s0, 1536 }
  0x15   :  { %s21_s16 = sshll.u32 %s3968_s15, 4  ;;  %p3870_p8 = scmp.ne.s32.totalorder %s4126_s0, %s3869_s19  ;;  %s22_s16 = int_to_ptr.vmem [resolvable:$true] %s21_s16 }
  0x16   :  { %p3873_p9 = scmp.lt.u32.totalorder %s3869_s19, %s4126_s0 }
  0x18   :  { %p3875_p10 = pnand %p3873_p9, %p3870_p8 }
  0x1a   :  { %3878 = shalt.err (!%p3875_p10)
}
  0x1b   :  { %s3879_s24 = scalar_lea.vmem %s22_s16, 1536  ;;  %p3884_p12 = scmp.lt.s32.totalorder %s22_s16, %s22_s16 }
  0x1c   :  { %p3880_p11 = scmp.ne.s32.totalorder %s22_s16, %s3879_s24  ;;  %p3885_p13 = scmp.lt.s32.totalorder %s3879_s24, %s3879_s24 }
  0x1e   :  { %p3886_p0 = por %p3885_p13, %p3884_p12 }
  0x20   :  { %p3887_p1 = pnand %p3886_p0, %p3880_p11 }
  0x22   :  { %3890 = shalt.err (!%p3887_p1)
}
  0x23   :  { %s3969_s1 = smov 768   ;;  %s3970_s25 = smov 48  }
  0x24   :  { %27 = dma.hbm_to_vmem [thread:$0]  %s4126_s0, 1536, %s22_s16, [#allocation3], %s3969_s1, %s3969_s1, %s3970_s25  }
  0x25   :  { %s3971_s28 = smov [#allocation7]   ;;  %s3972_s30 = smov [#allocation8]  }
  0x26   :  { %s47_s29 = sshll.u32 %s3971_s28, 4  ;;  %s61_s8 = sshll.u32 %s3972_s30, 4  ;;  %s48_s29 = int_to_ptr.vmem [resolvable:$true] %s47_s29  ;;  %s4045_s8 = int_to_ptr.vmem [resolvable:$true] %s61_s8 }
  0x27   :  { %s3891_s13 = scalar_lea.hbm %s4129_s3, 16384 }
  0x28   :  { %p3892_p2 = scmp.ne.s32.totalorder %s4129_s3, %s3891_s13  ;;  %p3895_p3 = scmp.lt.u32.totalorder %s3891_s13, %s4129_s3 }
  0x2a   :  { %p3897_p4 = pnand %p3895_p3, %p3892_p2 }
  0x2c   :  { %3900 = shalt.err (!%p3897_p4)
}
  0x2d   :  { %s3901_s0 = scalar_lea.vmem %s48_s29, 16384  ;;  %p3906_p6 = scmp.lt.s32.totalorder %s48_s29, %s48_s29 }
  0x2e   :  { %p3902_p5 = scmp.ne.s32.totalorder %s48_s29, %s3901_s0  ;;  %p3907_p7 = scmp.lt.s32.totalorder %s3901_s0, %s3901_s0 }
  0x30   :  { %p3908_p8 = por %p3907_p7, %p3906_p6 }
  0x32   :  { %p3909_p9 = pnand %p3908_p8, %p3902_p5 }
  0x34   :  { %3912 = shalt.err (!%p3909_p9)
}
  0x35   :  { %53 = dma.hbm_to_vmem [thread:$0]  %s4129_s3, 16384, %s48_s29, [#allocation6], %s3966_s11, %s3966_s11, %s3967_s12  }
  0x36   :  { %s3913_s22 = scalar_lea.hbm %s4131_s5, 4096 }
  0x37   :  { %p3914_p10 = scmp.ne.s32.totalorder %s4131_s5, %s3913_s22  ;;  %p3917_p11 = scmp.lt.u32.totalorder %s3913_s22, %s4131_s5 }
  0x39   :  { %p3919_p12 = pnand %p3917_p11, %p3914_p10 }
  0x3b   :  { %3922 = shalt.err (!%p3919_p12)
}
  0x3c   :  { %s3923_s26 = scalar_lea.vmem %s4045_s8, 4096  ;;  %p3928_p0 = scmp.lt.s32.totalorder %s4045_s8, %s4045_s8 }
  0x3d   :  { %p3924_p13 = scmp.ne.s32.totalorder %s4045_s8, %s3923_s26  ;;  %p3929_p1 = scmp.lt.s32.totalorder %s3923_s26, %s3923_s26 }
  0x3f   :  { %p3930_p2 = por %p3929_p1, %p3928_p0 }
  0x41   :  { %p3931_p3 = pnand %p3930_p2, %p3924_p13 }
  0x43   :  { %3934 = shalt.err (!%p3931_p3)
}
  0x44   :  { %s3973_s3 = smov 64   ;;  %s3974_s11 = smov 4  }
  0x45   :  { %67 = dma.hbm_to_vmem [thread:$0]  %s4131_s5, 4096, %s4045_s8, [#allocation9], %s3973_s3, %s3973_s3, %s3974_s11  }
  0x46   :  { %3957 = dma.done.wait [#allocation3], 1536  }
  0x47   :  { %3958 = vsyncadd [#allocation3], 4294965760 }
  0x48   :  { %3959 = dma.done.wait [#allocation6], 40960  }
  0x49   :  { %3960 = vsyncadd [#allocation6], 4294926336 }
  0x4a   :  { %3961 = dma.done.wait [#allocation9], 4096  }
  0x4b   :  { %3962 = vsyncadd [#allocation9], 4294963200  ;;  %v3335_v0 = vld [vmem:[#allocation5 + $0x4] ss:$16 sps:$4 sm:$0xff]   ;;  %v3337_v1 = vld [vmem:[#allocation5 + $0xc] ss:$16 sps:$4 sm:$0xff]  }
  0x4c   :  { %1275 = vmatprep.subr.bf16.mxu0 %v3335_v0  ;;  %v3339_v2 = vld [vmem:[#allocation5] ss:$16 sps:$4 sm:$0xff]   ;;  %v3340_v3 = vld [vmem:[#allocation5 + $0x8] ss:$16 sps:$4 sm:$0xff]   ;;  %1404 = vmatprep.subr.bf16.mxu1 %v3337_v1  ;;  %v3341_v4 = vld [vmem:[#allocation5 + $0x24] ss:$16 sps:$4 sm:$0xff]  }
  0x4d   :  { %1276 = vmatpush1.bf16.msra.mxu0 %v3339_v2  ;;  %1405 = vmatpush1.bf16.msra.mxu1 %v3340_v3  ;;  %v3343_v5 = vld [vmem:[#allocation5 + $0x2c] ss:$16 sps:$4 sm:$0xff]   ;;  %v3345_v6 = vld [vmem:[#allocation5 + $0x20] ss:$16 sps:$4 sm:$0xff]   ;;  %v3346_v7 = vld [vmem:[#allocation5 + $0x28] ss:$16 sps:$4 sm:$0xff]  }
  0x4e   :  { %1277 = vmatprep.subr.bf16.mxu0 %v3341_v4  ;;  %1406 = vmatprep.subr.bf16.mxu1 %v3343_v5  ;;  %v3347_v8 = vld [vmem:[#allocation5 + $0x44] ss:$16 sps:$4 sm:$0xff]   ;;  %v3349_v9 = vld [vmem:[#allocation5 + $0x4c] ss:$16 sps:$4 sm:$0xff]   ;;  %v3351_v10 = vld [vmem:[#allocation5 + $0x40] ss:$16 sps:$4 sm:$0xff]  }
  0x4f   :  { %v3352_v11 = vld [vmem:[#allocation5 + $0x48] ss:$16 sps:$4 sm:$0xff]   ;;  %v3353_v12 = vld [vmem:[#allocation5 + $0x64] ss:$16 sps:$4 sm:$0xff]   ;;  %v3355_v13 = vld [vmem:[#allocation5 + $0x6c] ss:$16 sps:$4 sm:$0xff]  }
  0x50   :  { %v3357_v14 = vld [vmem:[#allocation5 + $0x60] ss:$16 sps:$4 sm:$0xff]   ;;  %v3358_v15 = vld [vmem:[#allocation5 + $0x68] ss:$16 sps:$4 sm:$0xff]   ;;  %v3359_v16 = vld [vmem:[#allocation5 + $0x84] ss:$16 sps:$4 sm:$0xff]  }
  0x51   :  { %1278 = vmatpush1.bf16.msra.mxu0 %v3345_v6  ;;  %1407 = vmatpush1.bf16.msra.mxu1 %v3346_v7  ;;  %v3361_v17 = vld [vmem:[#allocation5 + $0x8c] ss:$16 sps:$4 sm:$0xff]   ;;  %v3363_v18 = vld [vmem:[#allocation5 + $0x80] ss:$16 sps:$4 sm:$0xff]   ;;  %v3364_v19 = vld [vmem:[#allocation5 + $0x88] ss:$16 sps:$4 sm:$0xff]  }
  0x52   :  { %1279 = vmatprep.subr.bf16.mxu0 %v3347_v8  ;;  %1408 = vmatprep.subr.bf16.mxu1 %v3349_v9  ;;  %v3365_v20 = vld [vmem:[#allocation5 + $0xa4] ss:$16 sps:$4 sm:$0xff]   ;;  %v3367_v21 = vld [vmem:[#allocation5 + $0xac] ss:$16 sps:$4 sm:$0xff]   ;;  %v3369_v22 = vld [vmem:[#allocation5 + $0xa0] ss:$16 sps:$4 sm:$0xff]  }
  0x53   :  { %v3370_v23 = vld [vmem:[#allocation5 + $0xa8] ss:$16 sps:$4 sm:$0xff]   ;;  %v3371_v24 = vld [vmem:[#allocation5 + $0xc4] ss:$16 sps:$4 sm:$0xff]   ;;  %v3373_v25 = vld [vmem:[#allocation5 + $0xcc] ss:$16 sps:$4 sm:$0xff]  }
  0x54   :  { %v3375_v26 = vld [vmem:[#allocation5 + $0xc0] ss:$16 sps:$4 sm:$0xff]   ;;  %v3376_v27 = vld [vmem:[#allocation5 + $0xc8] ss:$16 sps:$4 sm:$0xff]   ;;  %v3377_v28 = vld [vmem:[#allocation5 + $0xe4] ss:$16 sps:$4 sm:$0xff]  }
  0x55   :  { %1280 = vmatpush1.bf16.msra.mxu0 %v3351_v10  ;;  %1409 = vmatpush1.bf16.msra.mxu1 %v3352_v11  ;;  %v3379_v29 = vld [vmem:[#allocation5 + $0xec] ss:$16 sps:$4 sm:$0xff]   ;;  %v3381_v30 = vld [vmem:[#allocation5 + $0xe0] ss:$16 sps:$4 sm:$0xff]   ;;  %v3382_v31 = vld [vmem:[#allocation5 + $0xe8] ss:$16 sps:$4 sm:$0xff]  }
  0x56   :  { %1281 = vmatprep.subr.bf16.mxu0 %v3353_v12  ;;  %1410 = vmatprep.subr.bf16.mxu1 %v3355_v13  ;;  %v3383_v32 = vld [vmem:[#allocation5 + $0x104] ss:$16 sps:$4 sm:$0xff]   ;;  %v3385_v33 = vld [vmem:[#allocation5 + $0x10c] ss:$16 sps:$4 sm:$0xff]   ;;  %v3387_v34 = vld [vmem:[#allocation5 + $0x100] ss:$16 sps:$4 sm:$0xff]  }
  0x57   :  { %v3388_v35 = vld [vmem:[#allocation5 + $0x108] ss:$16 sps:$4 sm:$0xff]   ;;  %v3389_v36 = vld [vmem:[#allocation5 + $0x124] ss:$16 sps:$4 sm:$0xff]   ;;  %v3391_v37 = vld [vmem:[#allocation5 + $0x12c] ss:$16 sps:$4 sm:$0xff]  }
  0x58   :  { %v3393_v38 = vld [vmem:[#allocation5 + $0x120] ss:$16 sps:$4 sm:$0xff]   ;;  %v3394_v39 = vld [vmem:[#allocation5 + $0x128] ss:$16 sps:$4 sm:$0xff]   ;;  %v3395_v40 = vld [vmem:[#allocation5 + $0x144] ss:$16 sps:$4 sm:$0xff]  }
  0x59   :  { %1282 = vmatpush1.bf16.msra.mxu0 %v3357_v14  ;;  %1411 = vmatpush1.bf16.msra.mxu1 %v3358_v15  ;;  %v3397_v41 = vld [vmem:[#allocation5 + $0x14c] ss:$16 sps:$4 sm:$0xff]   ;;  %v3399_v42 = vld [vmem:[#allocation5 + $0x140] ss:$16 sps:$4 sm:$0xff]   ;;  %v3400_v43 = vld [vmem:[#allocation5 + $0x148] ss:$16 sps:$4 sm:$0xff]  }
  0x5a   :  { %1283 = vmatprep.subr.bf16.mxu0 %v3359_v16  ;;  %1412 = vmatprep.subr.bf16.mxu1 %v3361_v17  ;;  %v3401_v44 = vld [vmem:[#allocation5 + $0x164] ss:$16 sps:$4 sm:$0xff]   ;;  %v3403_v45 = vld [vmem:[#allocation5 + $0x16c] ss:$16 sps:$4 sm:$0xff]   ;;  %v3405_v48 = vld [vmem:[#allocation5 + $0x160] ss:$16 sps:$4 sm:$0xff]  }
  0x5b   :  { %v84_v46 = vld [vmem:[#allocation2 + $0x8] sm:$0xff]  ;;  %v90_v47 = vld [vmem:[#allocation2 + $0x38] sm:$0xff]  ;;  %v3407_v51 = vld [vmem:[#allocation5 + $0x184] ss:$16 sps:$4 sm:$0xff]   ;;  %s3975_s8 = smov [#allocation10]  }
  0x5c   :  { %v3406_v49 = vld [vmem:[#allocation5 + $0x168] ss:$16 sps:$4 sm:$0xff]   ;;  %v96_v50 = vpack.c.bf16 %v90_v47, %v84_v46  ;;  %v3409_v52 = vld [vmem:[#allocation5 + $0x18c] ss:$16 sps:$4 sm:$0xff]   ;;  %v3411_v53 = vld [vmem:[#allocation5 + $0x180] ss:$16 sps:$4 sm:$0xff]  }
  0x5d   :  { %1284 = vmatpush1.bf16.msra.mxu0 %v3363_v18  ;;  %1413 = vmatpush1.bf16.msra.mxu1 %v3364_v19  ;;  %v3412_v54 = vld [vmem:[#allocation5 + $0x188] ss:$16 sps:$4 sm:$0xff]   ;;  %v3413_v55 = vld [vmem:[#allocation5 + $0x1a4] ss:$16 sps:$4 sm:$0xff]   ;;  %v3415_v56 = vld [vmem:[#allocation5 + $0x1ac] ss:$16 sps:$4 sm:$0xff]  }
  0x5e   :  { %1285 = vmatprep.subr.bf16.mxu0 %v3365_v20  ;;  %1414 = vmatprep.subr.bf16.mxu1 %v3367_v21  ;;  %v3417_v57 = vld [vmem:[#allocation5 + $0x1a0] ss:$16 sps:$4 sm:$0xff]   ;;  %v3418_v58 = vld [vmem:[#allocation5 + $0x1a8] ss:$16 sps:$4 sm:$0xff]   ;;  %v3419_v59 = vld [vmem:[#allocation5 + $0x1c4] ss:$16 sps:$4 sm:$0xff]  }
  0x5f   :  { %1307 = vmatprep.mubr.bf16.mxu0 %v96_v50  ;;  %1436 = vmatprep.mubr.bf16.mxu1 %v96_v50  ;;  %v3421_v60 = vld [vmem:[#allocation5 + $0x1cc] ss:$16 sps:$4 sm:$0xff]   ;;  %v3423_v61 = vld [vmem:[#allocation5 + $0x1c0] ss:$16 sps:$4 sm:$0xff]   ;;  %v3424_v62 = vld [vmem:[#allocation5 + $0x1c8] ss:$16 sps:$4 sm:$0xff]  }
  0x60   :  { %v3425_v63 = vld [vmem:[#allocation5 + $0x1e4] ss:$16 sps:$4 sm:$0xff]   ;;  %v3427_v0 = vld [vmem:[#allocation5 + $0x1ec] ss:$16 sps:$4 sm:$0xff]   ;;  %v3429_v1 = vld [vmem:[#allocation5 + $0x1e0] ss:$16 sps:$4 sm:$0xff]  }
  0x61   :  { %1286 = vmatpush1.bf16.msra.mxu0 %v3369_v22  ;;  %1415 = vmatpush1.bf16.msra.mxu1 %v3370_v23  ;;  %v3430_v2 = vld [vmem:[#allocation5 + $0x1e8] ss:$16 sps:$4 sm:$0xff]   ;;  %v3433_v3 = vld [vmem:[#allocation5 + $0x204] ss:$16 sps:$4 sm:$0xff]   ;;  %v3436_v6 = vld [vmem:[#allocation5 + $0x20c] ss:$16 sps:$4 sm:$0xff]  }
  0x62   :  { %1287 = vmatprep.subr.bf16.mxu0 %v3371_v24  ;;  %1416 = vmatprep.subr.bf16.mxu1 %v3373_v25  ;;  %v83_v4 = vld [vmem:[#allocation2] sm:$0xff]  ;;  %v89_v5 = vld [vmem:[#allocation2 + $0x30] sm:$0xff]  ;;  %v3434_v8 = vld [vmem:[#allocation5 + $0x208] ss:$16 sps:$4 sm:$0xff]   ;;  %s2871_s9 = sshll.u32 %s3975_s8, 4  ;;  %s2872_s9 = int_to_ptr.vmem [resolvable:$true] %s2871_s9 }
  0x63   :  { %v3431_v7 = vld [vmem:[#allocation5 + $0x200] ss:$16 sps:$4 sm:$0xff]   ;;  %v95_v9 = vpack.c.bf16 %v89_v5, %v83_v4  ;;  %v3439_v10 = vld [vmem:[#allocation5 + $0x224] ss:$16 sps:$4 sm:$0xff]   ;;  %v3442_v11 = vld [vmem:[#allocation5 + $0x22c] ss:$16 sps:$4 sm:$0xff]   ;;  %p3940_p5 = scmp.lt.s32.totalorder %s2872_s9, %s2872_s9 }
  0x64   :  { %v3437_v12 = vld [vmem:[#allocation5 + $0x220] ss:$16 sps:$4 sm:$0xff]   ;;  %v3440_v13 = vld [vmem:[#allocation5 + $0x228] ss:$16 sps:$4 sm:$0xff]   ;;  %v3445_v14 = vld [vmem:[#allocation5 + $0x244] ss:$16 sps:$4 sm:$0xff]  }
  0x65   :  { %1288 = vmatpush1.bf16.msra.mxu0 %v3375_v26  ;;  %1417 = vmatpush1.bf16.msra.mxu1 %v3376_v27  ;;  %v3448_v15 = vld [vmem:[#allocation5 + $0x24c] ss:$16 sps:$4 sm:$0xff]   ;;  %v3443_v16 = vld [vmem:[#allocation5 + $0x240] ss:$16 sps:$4 sm:$0xff]   ;;  %v3446_v17 = vld [vmem:[#allocation5 + $0x248] ss:$16 sps:$4 sm:$0xff]  }
  0x66   :  { %1289 = vmatprep.subr.bf16.mxu0 %v3377_v28  ;;  %1418 = vmatprep.subr.bf16.mxu1 %v3379_v29  ;;  %v3451_v18 = vld [vmem:[#allocation5 + $0x264] ss:$16 sps:$4 sm:$0xff]   ;;  %v3454_v19 = vld [vmem:[#allocation5 + $0x26c] ss:$16 sps:$4 sm:$0xff]   ;;  %v3449_v20 = vld [vmem:[#allocation5 + $0x260] ss:$16 sps:$4 sm:$0xff]  }
  0x67   :  { %v3452_v21 = vld [vmem:[#allocation5 + $0x268] ss:$16 sps:$4 sm:$0xff]   ;;  %v3457_v22 = vld [vmem:[#allocation5 + $0x284] ss:$16 sps:$4 sm:$0xff]   ;;  %v3460_v23 = vld [vmem:[#allocation5 + $0x28c] ss:$16 sps:$4 sm:$0xff]  }
  0x68   :  { %v3455_v24 = vld [vmem:[#allocation5 + $0x280] ss:$16 sps:$4 sm:$0xff]   ;;  %v3458_v25 = vld [vmem:[#allocation5 + $0x288] ss:$16 sps:$4 sm:$0xff]   ;;  %v3463_v26 = vld [vmem:[#allocation5 + $0x2a4] ss:$16 sps:$4 sm:$0xff]  }
  0x69   :  { %1290 = vmatpush1.bf16.msra.mxu0 %v3381_v30  ;;  %1419 = vmatpush1.bf16.msra.mxu1 %v3382_v31  ;;  %v3466_v27 = vld [vmem:[#allocation5 + $0x2ac] ss:$16 sps:$4 sm:$0xff]   ;;  %v3461_v28 = vld [vmem:[#allocation5 + $0x2a0] ss:$16 sps:$4 sm:$0xff]   ;;  %v3464_v29 = vld [vmem:[#allocation5 + $0x2a8] ss:$16 sps:$4 sm:$0xff]  }
  0x6a   :  { %1291 = vmatprep.subr.bf16.mxu0 %v3383_v32  ;;  %1420 = vmatprep.subr.bf16.mxu1 %v3385_v33  ;;  %v3469_v30 = vld [vmem:[#allocation5 + $0x2c4] ss:$16 sps:$4 sm:$0xff]   ;;  %v3472_v31 = vld [vmem:[#allocation5 + $0x2cc] ss:$16 sps:$4 sm:$0xff]   ;;  %v3485_v47 = vld [vmem:[#allocation5 + $0x320] ss:$16 sps:$4 sm:$0xff]  }
  0x6b   :  { %v86_v32 = vld [vmem:[#allocation2 + $0x18] sm:$0xff]  ;;  %v92_v33 = vld [vmem:[#allocation2 + $0x48] sm:$0xff]  ;;  %v3523_v5 = vld [vmem:[#allocation5 + $0x3e4] ss:$16 sps:$4 sm:$0xff]  }
  0x6c   :  { %v3490_v46 = vld [vmem:[#allocation5 + $0x32c] ss:$16 sps:$4 sm:$0xff]   ;;  %v3518_v4 = vld [vmem:[#allocation5 + $0x3c8] ss:$16 sps:$4 sm:$0xff]  }
  0x6d   :  { %1292 = vmatpush1.bf16.msra.mxu0 %v3387_v34  ;;  %1421 = vmatpush1.bf16.msra.mxu1 %v3388_v35  ;;  %v3467_v34 = vld [vmem:[#allocation5 + $0x2c0] ss:$16 sps:$4 sm:$0xff]   ;;  %v3470_v35 = vld [vmem:[#allocation5 + $0x2c8] ss:$16 sps:$4 sm:$0xff]   ;;  %v3496_v50 = vld [vmem:[#allocation5 + $0x34c] ss:$16 sps:$4 sm:$0xff]  }
  0x6e   :  { %1293 = vmatprep.subr.bf16.mxu0 %v3389_v36  ;;  %1422 = vmatprep.subr.bf16.mxu1 %v3391_v37  ;;  %v98_v36 = vpack.c.bf16 %v92_v33, %v86_v32  ;;  %v3475_v37 = vld [vmem:[#allocation5 + $0x2e4] ss:$16 sps:$4 sm:$0xff]   ;;  %v3556_v32 = vld [vmem:[#allocation5 + $0x48c] ss:$16 sps:$4 sm:$0xff]   ;;  %v3551_v33 = vld [vmem:[#allocation5 + $0x480] ss:$16 sps:$4 sm:$0xff]  }
  0x71   :  { %1294 = vmatpush1.bf16.msra.mxu0 %v3393_v38  ;;  %1423 = vmatpush1.bf16.msra.mxu1 %v3394_v39  ;;  %v3478_v38 = vld [vmem:[#allocation5 + $0x2ec] ss:$16 sps:$4 sm:$0xff]   ;;  %v3473_v39 = vld [vmem:[#allocation5 + $0x2e0] ss:$16 sps:$4 sm:$0xff]  }
  0x72   :  { %1295 = vmatprep.subr.bf16.mxu0 %v3395_v40  ;;  %1424 = vmatprep.subr.bf16.mxu1 %v3397_v41  ;;  %v3476_v40 = vld [vmem:[#allocation5 + $0x2e8] ss:$16 sps:$4 sm:$0xff]   ;;  %v3481_v41 = vld [vmem:[#allocation5 + $0x304] ss:$16 sps:$4 sm:$0xff]  }
  0x75   :  { %1296 = vmatpush1.bf16.msra.mxu0 %v3399_v42  ;;  %1425 = vmatpush1.bf16.msra.mxu1 %v3400_v43  ;;  %v3484_v42 = vld [vmem:[#allocation5 + $0x30c] ss:$16 sps:$4 sm:$0xff]   ;;  %v3479_v43 = vld [vmem:[#allocation5 + $0x300] ss:$16 sps:$4 sm:$0xff]  }
  0x76   :  { %1297 = vmatprep.subr.bf16.mxu0 %v3401_v44  ;;  %1426 = vmatprep.subr.bf16.mxu1 %v3403_v45  ;;  %v3482_v44 = vld [vmem:[#allocation5 + $0x308] ss:$16 sps:$4 sm:$0xff]   ;;  %v3487_v45 = vld [vmem:[#allocation5 + $0x324] ss:$16 sps:$4 sm:$0xff]  }
  0x79   :  { %1298 = vmatpush1.bf16.msra.mxu0 %v3405_v48  ;;  %1427 = vmatpush1.bf16.msra.mxu1 %v3406_v49  ;;  %v3488_v48 = vld [vmem:[#allocation5 + $0x328] ss:$16 sps:$4 sm:$0xff]   ;;  %v3493_v49 = vld [vmem:[#allocation5 + $0x344] ss:$16 sps:$4 sm:$0xff]  }
  0x7a   :  { %1299 = vmatprep.subr.bf16.mxu0 %v3407_v51  ;;  %1428 = vmatprep.subr.bf16.mxu1 %v3409_v52  ;;  %v3491_v51 = vld [vmem:[#allocation5 + $0x340] ss:$16 sps:$4 sm:$0xff]   ;;  %v3494_v52 = vld [vmem:[#allocation5 + $0x348] ss:$16 sps:$4 sm:$0xff]  }
  0x7d   :  { %1300 = vmatpush1.bf16.msra.mxu0 %v3411_v53  ;;  %1429 = vmatpush1.bf16.msra.mxu1 %v3412_v54  ;;  %v3499_v53 = vld [vmem:[#allocation5 + $0x364] ss:$16 sps:$4 sm:$0xff]   ;;  %v3502_v54 = vld [vmem:[#allocation5 + $0x36c] ss:$16 sps:$4 sm:$0xff]  }
  0x7e   :  { %1301 = vmatprep.subr.bf16.mxu0 %v3413_v55  ;;  %1430 = vmatprep.subr.bf16.mxu1 %v3415_v56  ;;  %v3497_v55 = vld [vmem:[#allocation5 + $0x360] ss:$16 sps:$4 sm:$0xff]   ;;  %v3500_v56 = vld [vmem:[#allocation5 + $0x368] ss:$16 sps:$4 sm:$0xff]  }
  0x81   :  { %1302 = vmatpush1.bf16.msra.mxu0 %v3417_v57  ;;  %1431 = vmatpush1.bf16.msra.mxu1 %v3418_v58  ;;  %v3505_v57 = vld [vmem:[#allocation5 + $0x384] ss:$16 sps:$4 sm:$0xff]   ;;  %v3508_v58 = vld [vmem:[#allocation5 + $0x38c] ss:$16 sps:$4 sm:$0xff]  }
  0x82   :  { %1303 = vmatprep.subr.bf16.mxu0 %v3419_v59  ;;  %1432 = vmatprep.subr.bf16.mxu1 %v3421_v60  ;;  %v3503_v59 = vld [vmem:[#allocation5 + $0x380] ss:$16 sps:$4 sm:$0xff]   ;;  %v3506_v60 = vld [vmem:[#allocation5 + $0x388] ss:$16 sps:$4 sm:$0xff]  }
  0x85   :  { %1304 = vmatpush1.bf16.msra.mxu0 %v3423_v61  ;;  %1433 = vmatpush1.bf16.msra.mxu1 %v3424_v62  ;;  %v3511_v61 = vld [vmem:[#allocation5 + $0x3a4] ss:$16 sps:$4 sm:$0xff]   ;;  %v3514_v62 = vld [vmem:[#allocation5 + $0x3ac] ss:$16 sps:$4 sm:$0xff]  }
  0x86   :  { %1305 = vmatprep.subr.bf16.mxu0 %v3425_v63  ;;  %1434 = vmatprep.subr.bf16.mxu1 %v3427_v0  ;;  %v3509_v63 = vld [vmem:[#allocation5 + $0x3a0] ss:$16 sps:$4 sm:$0xff]   ;;  %v3512_v0 = vld [vmem:[#allocation5 + $0x3a8] ss:$16 sps:$4 sm:$0xff]  }
  0x89   :  { %1306 = vmatpush1.bf16.msra.mxu0 %v3429_v1  ;;  %1435 = vmatpush1.bf16.msra.mxu1 %v3430_v2  ;;  %v3517_v1 = vld [vmem:[#allocation5 + $0x3c4] ss:$16 sps:$4 sm:$0xff]   ;;  %v3520_v2 = vld [vmem:[#allocation5 + $0x3cc] ss:$16 sps:$4 sm:$0xff]  }
  0x8a   :  { %1318 = vmatprep.subr.bf16.mxu0 %v3433_v3  ;;  %1447 = vmatprep.subr.bf16.mxu1 %v3436_v6  ;;  %v3515_v3 = vld [vmem:[#allocation5 + $0x3c0] ss:$16 sps:$4 sm:$0xff]   ;;  %v3526_v6 = vld [vmem:[#allocation5 + $0x3ec] ss:$16 sps:$4 sm:$0xff]  }
  0x8c   :  { %1308 = vmatmul.mubr.bf16.vlgmr.msra.gmra.mrb[0].mxu0 %v95_v9  ;;  %1437 = vmatmul.mubr.bf16.vlgmr.msra.gmra.mrb[0].mxu1 %v95_v9  ;;  %v3529_v9 = vld [vmem:[#allocation5 + $0x404] ss:$16 sps:$4 sm:$0xff]  }
  0x8d   :  { %1319 = vmatpush1.bf16.msra.mxu0 %v3431_v7  ;;  %1448 = vmatpush1.bf16.msra.mxu1 %v3434_v8  ;;  %v3521_v7 = vld [vmem:[#allocation5 + $0x3e0] ss:$16 sps:$4 sm:$0xff]   ;;  %v3524_v8 = vld [vmem:[#allocation5 + $0x3e8] ss:$16 sps:$4 sm:$0xff]  }
  0x8e   :  { %1320 = vmatprep.subr.bf16.mxu0 %v3439_v10  ;;  %1449 = vmatprep.subr.bf16.mxu1 %v3442_v11  ;;  %v85_v10 = vld [vmem:[#allocation2 + $0x10] sm:$0xff]  ;;  %v91_v11 = vld [vmem:[#allocation2 + $0x40] sm:$0xff] }
  0x8f   :  { %1350 = vmatprep.mubr.bf16.mxu0 %v98_v36  ;;  %1479 = vmatprep.mubr.bf16.mxu1 %v98_v36  ;;  %v3562_v36 = vld [vmem:[#allocation5 + $0x4ac] ss:$16 sps:$4 sm:$0xff]  }
  0x91   :  { %1321 = vmatpush1.bf16.msra.mxu0 %v3437_v12  ;;  %1450 = vmatpush1.bf16.msra.mxu1 %v3440_v13  ;;  %v3532_v12 = vld [vmem:[#allocation5 + $0x40c] ss:$16 sps:$4 sm:$0xff]   ;;  %v3527_v13 = vld [vmem:[#allocation5 + $0x400] ss:$16 sps:$4 sm:$0xff]  }
  0x92   :  { %1322 = vmatprep.subr.bf16.mxu0 %v3445_v14  ;;  %1451 = vmatprep.subr.bf16.mxu1 %v3448_v15  ;;  %v3530_v14 = vld [vmem:[#allocation5 + $0x408] ss:$16 sps:$4 sm:$0xff]   ;;  %v97_v15 = vpack.c.bf16 %v91_v11, %v85_v10  ;;  %v3619_v11 = vld [vmem:[#allocation5 + $0x5e4] ss:$16 sps:$4 sm:$0xff]  }
  0x93   :  { %v3614_v10 = vld [vmem:[#allocation5 + $0x5c8] ss:$16 sps:$4 sm:$0xff]  }
  0x95   :  { %1323 = vmatpush1.bf16.msra.mxu0 %v3443_v16  ;;  %1452 = vmatpush1.bf16.msra.mxu1 %v3446_v17  ;;  %v3535_v16 = vld [vmem:[#allocation5 + $0x424] ss:$16 sps:$4 sm:$0xff]   ;;  %v3538_v17 = vld [vmem:[#allocation5 + $0x42c] ss:$16 sps:$4 sm:$0xff]  }
  0x96   :  { %1324 = vmatprep.subr.bf16.mxu0 %v3451_v18  ;;  %1453 = vmatprep.subr.bf16.mxu1 %v3454_v19  ;;  %v88_v18 = vld [vmem:[#allocation2 + $0x28] sm:$0xff]  ;;  %v3533_v19 = vld [vmem:[#allocation5 + $0x420] ss:$16 sps:$4 sm:$0xff]  }
  0x99   :  { %1325 = vmatpush1.bf16.msra.mxu0 %v3449_v20  ;;  %1454 = vmatpush1.bf16.msra.mxu1 %v3452_v21  ;;  %v3536_v20 = vld [vmem:[#allocation5 + $0x428] ss:$16 sps:$4 sm:$0xff]  }
  0x9a   :  { %1326 = vmatprep.subr.bf16.mxu0 %v3457_v22  ;;  %1455 = vmatprep.subr.bf16.mxu1 %v3460_v23  ;;  %v94_v21 = vld [vmem:[#allocation2 + $0x58] sm:$0xff]  ;;  %v3541_v22 = vld [vmem:[#allocation5 + $0x444] ss:$16 sps:$4 sm:$0xff]  }
  0x9b   :  { %v100_v23 = vpack.c.bf16 %v94_v21, %v88_v18  ;;  %v3628_v18 = vld [vmem:[#allocation7 + $0xc] ss:$16 sps:$4 sm:$0xff]  }
  0x9d   :  { %1327 = vmatpush1.bf16.msra.mxu0 %v3455_v24  ;;  %1456 = vmatpush1.bf16.msra.mxu1 %v3458_v25  ;;  %v3544_v24 = vld [vmem:[#allocation5 + $0x44c] ss:$16 sps:$4 sm:$0xff]   ;;  %v3539_v25 = vld [vmem:[#allocation5 + $0x440] ss:$16 sps:$4 sm:$0xff]  }
  0x9e   :  { %1328 = vmatprep.subr.bf16.mxu0 %v3463_v26  ;;  %1457 = vmatprep.subr.bf16.mxu1 %v3466_v27  ;;  %v3542_v26 = vld [vmem:[#allocation5 + $0x448] ss:$16 sps:$4 sm:$0xff]   ;;  %v3547_v27 = vld [vmem:[#allocation5 + $0x464] ss:$16 sps:$4 sm:$0xff]  }
  0xa1   :  { %1329 = vmatpush1.bf16.msra.mxu0 %v3461_v28  ;;  %1458 = vmatpush1.bf16.msra.mxu1 %v3464_v29  ;;  %v3550_v28 = vld [vmem:[#allocation5 + $0x46c] ss:$16 sps:$4 sm:$0xff]   ;;  %v3545_v29 = vld [vmem:[#allocation5 + $0x460] ss:$16 sps:$4 sm:$0xff]  }
  0xa2   :  { %1330 = vmatprep.subr.bf16.mxu0 %v3469_v30  ;;  %1459 = vmatprep.subr.bf16.mxu1 %v3472_v31  ;;  %v3548_v30 = vld [vmem:[#allocation5 + $0x468] ss:$16 sps:$4 sm:$0xff]   ;;  %v3553_v31 = vld [vmem:[#allocation5 + $0x484] ss:$16 sps:$4 sm:$0xff]  }
  0xa5   :  { %1331 = vmatpush1.bf16.msra.mxu0 %v3467_v34  ;;  %1460 = vmatpush1.bf16.msra.mxu1 %v3470_v35  ;;  %v3554_v34 = vld [vmem:[#allocation5 + $0x488] ss:$16 sps:$4 sm:$0xff]   ;;  %v3559_v35 = vld [vmem:[#allocation5 + $0x4a4] ss:$16 sps:$4 sm:$0xff]  }
  0xa6   :  { %1332 = vmatprep.subr.bf16.mxu0 %v3475_v37  ;;  %1461 = vmatprep.subr.bf16.mxu1 %v3478_v38  ;;  %v3557_v37 = vld [vmem:[#allocation5 + $0x4a0] ss:$16 sps:$4 sm:$0xff]   ;;  %v3560_v38 = vld [vmem:[#allocation5 + $0x4a8] ss:$16 sps:$4 sm:$0xff]  }
  0xa9   :  { %1333 = vmatpush1.bf16.msra.mxu0 %v3473_v39  ;;  %1462 = vmatpush1.bf16.msra.mxu1 %v3476_v40  ;;  %v3565_v39 = vld [vmem:[#allocation5 + $0x4c4] ss:$16 sps:$4 sm:$0xff]   ;;  %v3568_v40 = vld [vmem:[#allocation5 + $0x4cc] ss:$16 sps:$4 sm:$0xff]  }
  0xaa   :  { %1334 = vmatprep.subr.bf16.mxu0 %v3481_v41  ;;  %1463 = vmatprep.subr.bf16.mxu1 %v3484_v42  ;;  %v3563_v41 = vld [vmem:[#allocation5 + $0x4c0] ss:$16 sps:$4 sm:$0xff]   ;;  %v3566_v42 = vld [vmem:[#allocation5 + $0x4c8] ss:$16 sps:$4 sm:$0xff]  }
  0xad   :  { %1335 = vmatpush1.bf16.msra.mxu0 %v3479_v43  ;;  %1464 = vmatpush1.bf16.msra.mxu1 %v3482_v44  ;;  %v3571_v43 = vld [vmem:[#allocation5 + $0x4e4] ss:$16 sps:$4 sm:$0xff]   ;;  %v3574_v44 = vld [vmem:[#allocation5 + $0x4ec] ss:$16 sps:$4 sm:$0xff]  }
  0xae   :  { %1336 = vmatprep.subr.bf16.mxu0 %v3487_v45  ;;  %1465 = vmatprep.subr.bf16.mxu1 %v3490_v46  ;;  %v3569_v45 = vld [vmem:[#allocation5 + $0x4e0] ss:$16 sps:$4 sm:$0xff]   ;;  %v3572_v46 = vld [vmem:[#allocation5 + $0x4e8] ss:$16 sps:$4 sm:$0xff]  }
  0xb1   :  { %1337 = vmatpush1.bf16.msra.mxu0 %v3485_v47  ;;  %1466 = vmatpush1.bf16.msra.mxu1 %v3488_v48  ;;  %v3577_v47 = vld [vmem:[#allocation5 + $0x504] ss:$16 sps:$4 sm:$0xff]   ;;  %v3580_v48 = vld [vmem:[#allocation5 + $0x50c] ss:$16 sps:$4 sm:$0xff]  }
  0xb2   :  { %1338 = vmatprep.subr.bf16.mxu0 %v3493_v49  ;;  %1467 = vmatprep.subr.bf16.mxu1 %v3496_v50  ;;  %v3575_v49 = vld [vmem:[#allocation5 + $0x500] ss:$16 sps:$4 sm:$0xff]   ;;  %v3578_v50 = vld [vmem:[#allocation5 + $0x508] ss:$16 sps:$4 sm:$0xff]  }
  0xb5   :  { %1339 = vmatpush1.bf16.msra.mxu0 %v3491_v51  ;;  %1468 = vmatpush1.bf16.msra.mxu1 %v3494_v52  ;;  %v3583_v51 = vld [vmem:[#allocation5 + $0x524] ss:$16 sps:$4 sm:$0xff]   ;;  %v3586_v52 = vld [vmem:[#allocation5 + $0x52c] ss:$16 sps:$4 sm:$0xff]  }
  0xb6   :  { %1340 = vmatprep.subr.bf16.mxu0 %v3499_v53  ;;  %1469 = vmatprep.subr.bf16.mxu1 %v3502_v54  ;;  %v3581_v53 = vld [vmem:[#allocation5 + $0x520] ss:$16 sps:$4 sm:$0xff]   ;;  %v3584_v54 = vld [vmem:[#allocation5 + $0x528] ss:$16 sps:$4 sm:$0xff]  }
  0xb9   :  { %1341 = vmatpush1.bf16.msra.mxu0 %v3497_v55  ;;  %1470 = vmatpush1.bf16.msra.mxu1 %v3500_v56  ;;  %v3589_v55 = vld [vmem:[#allocation5 + $0x544] ss:$16 sps:$4 sm:$0xff]   ;;  %v3592_v56 = vld [vmem:[#allocation5 + $0x54c] ss:$16 sps:$4 sm:$0xff]  }
  0xba   :  { %1342 = vmatprep.subr.bf16.mxu0 %v3505_v57  ;;  %1471 = vmatprep.subr.bf16.mxu1 %v3508_v58  ;;  %v3587_v57 = vld [vmem:[#allocation5 + $0x540] ss:$16 sps:$4 sm:$0xff]   ;;  %v3590_v58 = vld [vmem:[#allocation5 + $0x548] ss:$16 sps:$4 sm:$0xff]  }
  0xbd   :  { %1343 = vmatpush1.bf16.msra.mxu0 %v3503_v59  ;;  %1472 = vmatpush1.bf16.msra.mxu1 %v3506_v60  ;;  %v3595_v59 = vld [vmem:[#allocation5 + $0x564] ss:$16 sps:$4 sm:$0xff]   ;;  %v3598_v60 = vld [vmem:[#allocation5 + $0x56c] ss:$16 sps:$4 sm:$0xff]  }
  0xbe   :  { %1344 = vmatprep.subr.bf16.mxu0 %v3511_v61  ;;  %1473 = vmatprep.subr.bf16.mxu1 %v3514_v62  ;;  %v3593_v61 = vld [vmem:[#allocation5 + $0x560] ss:$16 sps:$4 sm:$0xff]   ;;  %v3596_v62 = vld [vmem:[#allocation5 + $0x568] ss:$16 sps:$4 sm:$0xff]  }
  0xc1   :  { %1345 = vmatpush1.bf16.msra.mxu0 %v3509_v63  ;;  %1474 = vmatpush1.bf16.msra.mxu1 %v3512_v0  ;;  %v3601_v63 = vld [vmem:[#allocation5 + $0x584] ss:$16 sps:$4 sm:$0xff]   ;;  %v3604_v0 = vld [vmem:[#allocation5 + $0x58c] ss:$16 sps:$4 sm:$0xff]  }
  0xc2   :  { %1346 = vmatprep.subr.bf16.mxu0 %v3517_v1  ;;  %1475 = vmatprep.subr.bf16.mxu1 %v3520_v2  ;;  %v3599_v1 = vld [vmem:[#allocation5 + $0x580] ss:$16 sps:$4 sm:$0xff]   ;;  %v3602_v2 = vld [vmem:[#allocation5 + $0x588] ss:$16 sps:$4 sm:$0xff]  }
  0xc5   :  { %1347 = vmatpush1.bf16.msra.mxu0 %v3515_v3  ;;  %1476 = vmatpush1.bf16.msra.mxu1 %v3518_v4  ;;  %v3607_v3 = vld [vmem:[#allocation5 + $0x5a4] ss:$16 sps:$4 sm:$0xff]   ;;  %v3610_v4 = vld [vmem:[#allocation5 + $0x5ac] ss:$16 sps:$4 sm:$0xff]  }
  0xc6   :  { %1348 = vmatprep.subr.bf16.mxu0 %v3523_v5  ;;  %1477 = vmatprep.subr.bf16.mxu1 %v3526_v6  ;;  %v3605_v5 = vld [vmem:[#allocation5 + $0x5a0] ss:$16 sps:$4 sm:$0xff]   ;;  %v3608_v6 = vld [vmem:[#allocation5 + $0x5a8] ss:$16 sps:$4 sm:$0xff]  }
  0xc9   :  { %1349 = vmatpush1.bf16.msra.mxu0 %v3521_v7  ;;  %1478 = vmatpush1.bf16.msra.mxu1 %v3524_v8  ;;  %v3613_v7 = vld [vmem:[#allocation5 + $0x5c4] ss:$16 sps:$4 sm:$0xff]   ;;  %v3616_v8 = vld [vmem:[#allocation5 + $0x5cc] ss:$16 sps:$4 sm:$0xff]  }
  0xca   :  { %1361 = vmatprep.subr.bf16.mxu0 %v3529_v9  ;;  %1490 = vmatprep.subr.bf16.mxu1 %v3532_v12  ;;  %v3611_v9 = vld [vmem:[#allocation5 + $0x5c0] ss:$16 sps:$4 sm:$0xff]   ;;  %v3622_v12 = vld [vmem:[#allocation5 + $0x5ec] ss:$16 sps:$4 sm:$0xff]  }
  0xcc   :  { %1351 = vmatmul.mubr.bf16.vlgmr.msra.gmra.mrb[0].mxu0 %v97_v15  ;;  %1480 = vmatmul.mubr.bf16.vlgmr.msra.gmra.mrb[0].mxu1 %v97_v15  ;;  %v87_v15 = vld [vmem:[#allocation2 + $0x20] sm:$0xff] }
  0xcd   :  { %1362 = vmatpush1.bf16.msra.mxu0 %v3527_v13  ;;  %1491 = vmatpush1.bf16.msra.mxu1 %v3530_v14  ;;  %v3617_v13 = vld [vmem:[#allocation5 + $0x5e0] ss:$16 sps:$4 sm:$0xff]   ;;  %v3620_v14 = vld [vmem:[#allocation5 + $0x5e8] ss:$16 sps:$4 sm:$0xff]  }
  0xce   :  { %1363 = vmatprep.subr.bf16.mxu0 %v3535_v16  ;;  %1492 = vmatprep.subr.bf16.mxu1 %v3538_v17  ;;  %v93_v16 = vld [vmem:[#allocation2 + $0x50] sm:$0xff] }
  0xcf   :  { %1393 = vmatprep.mubr.bf16.mxu0 %v100_v23  ;;  %1522 = vmatprep.mubr.bf16.mxu1 %v100_v23  ;;  %v3625_v17 = vld [vmem:[#allocation7 + $0x4] ss:$16 sps:$4 sm:$0xff]   ;;  %v99_v21 = vpack.c.bf16 %v93_v16, %v87_v15  ;;  %v3634_v23 = vld [vmem:[#allocation7 + $0x2c] ss:$16 sps:$4 sm:$0xff]   ;;  %v3713_v16 = vld [vmem:[#allocation7 + $0x1e0] ss:$16 sps:$4 sm:$0xff]  }
  0xd0   :  { %v3718_v15 = vld [vmem:[#allocation7 + $0x1ec] ss:$16 sps:$4 sm:$0xff]  }
  0xd1   :  { %1364 = vmatpush1.bf16.msra.mxu0 %v3533_v19  ;;  %1493 = vmatpush1.bf16.msra.mxu1 %v3536_v20  ;;  %v3623_v19 = vld [vmem:[#allocation7] ss:$16 sps:$4 sm:$0xff]   ;;  %v3626_v20 = vld [vmem:[#allocation7 + $0x8] ss:$16 sps:$4 sm:$0xff]  }
  0xd2   :  { %1365 = vmatprep.subr.bf16.mxu0 %v3541_v22  ;;  %1494 = vmatprep.subr.bf16.mxu1 %v3544_v24  ;;  %v3631_v22 = vld [vmem:[#allocation7 + $0x24] ss:$16 sps:$4 sm:$0xff]   ;;  %v3629_v24 = vld [vmem:[#allocation7 + $0x20] ss:$16 sps:$4 sm:$0xff]  }
  0xd5   :  { %1366 = vmatpush1.bf16.msra.mxu0 %v3539_v25  ;;  %1495 = vmatpush1.bf16.msra.mxu1 %v3542_v26  ;;  %v3632_v25 = vld [vmem:[#allocation7 + $0x28] ss:$16 sps:$4 sm:$0xff]   ;;  %v3637_v26 = vld [vmem:[#allocation7 + $0x44] ss:$16 sps:$4 sm:$0xff]  }
  0xd6   :  { %1367 = vmatprep.subr.bf16.mxu0 %v3547_v27  ;;  %1496 = vmatprep.subr.bf16.mxu1 %v3550_v28  ;;  %v3640_v27 = vld [vmem:[#allocation7 + $0x4c] ss:$16 sps:$4 sm:$0xff]   ;;  %v3635_v28 = vld [vmem:[#allocation7 + $0x40] ss:$16 sps:$4 sm:$0xff]  }
  0xd9   :  { %1368 = vmatpush1.bf16.msra.mxu0 %v3545_v29  ;;  %1497 = vmatpush1.bf16.msra.mxu1 %v3548_v30  ;;  %v3638_v29 = vld [vmem:[#allocation7 + $0x48] ss:$16 sps:$4 sm:$0xff]   ;;  %v3643_v30 = vld [vmem:[#allocation7 + $0x64] ss:$16 sps:$4 sm:$0xff]  }
  0xda   :  { %1369 = vmatprep.subr.bf16.mxu0 %v3553_v31  ;;  %1498 = vmatprep.subr.bf16.mxu1 %v3556_v32  ;;  %v3646_v31 = vld [vmem:[#allocation7 + $0x6c] ss:$16 sps:$4 sm:$0xff]   ;;  %v3641_v32 = vld [vmem:[#allocation7 + $0x60] ss:$16 sps:$4 sm:$0xff]  }
  0xdd   :  { %1370 = vmatpush1.bf16.msra.mxu0 %v3551_v33  ;;  %1499 = vmatpush1.bf16.msra.mxu1 %v3554_v34  ;;  %v3644_v33 = vld [vmem:[#allocation7 + $0x68] ss:$16 sps:$4 sm:$0xff]   ;;  %v3649_v34 = vld [vmem:[#allocation7 + $0x84] ss:$16 sps:$4 sm:$0xff]  }
  0xde   :  { %1371 = vmatprep.subr.bf16.mxu0 %v3559_v35  ;;  %1500 = vmatprep.subr.bf16.mxu1 %v3562_v36  ;;  %v3652_v35 = vld [vmem:[#allocation7 + $0x8c] ss:$16 sps:$4 sm:$0xff]   ;;  %v3647_v36 = vld [vmem:[#allocation7 + $0x80] ss:$16 sps:$4 sm:$0xff]  }
  0xe1   :  { %1372 = vmatpush1.bf16.msra.mxu0 %v3557_v37  ;;  %1501 = vmatpush1.bf16.msra.mxu1 %v3560_v38  ;;  %v3650_v37 = vld [vmem:[#allocation7 + $0x88] ss:$16 sps:$4 sm:$0xff]   ;;  %v3655_v38 = vld [vmem:[#allocation7 + $0xa4] ss:$16 sps:$4 sm:$0xff]  }
  0xe2   :  { %1373 = vmatprep.subr.bf16.mxu0 %v3565_v39  ;;  %1502 = vmatprep.subr.bf16.mxu1 %v3568_v40  ;;  %v3658_v39 = vld [vmem:[#allocation7 + $0xac] ss:$16 sps:$4 sm:$0xff]   ;;  %v3653_v40 = vld [vmem:[#allocation7 + $0xa0] ss:$16 sps:$4 sm:$0xff]  }
  0xe5   :  { %1374 = vmatpush1.bf16.msra.mxu0 %v3563_v41  ;;  %1503 = vmatpush1.bf16.msra.mxu1 %v3566_v42  ;;  %v3656_v41 = vld [vmem:[#allocation7 + $0xa8] ss:$16 sps:$4 sm:$0xff]   ;;  %v3661_v42 = vld [vmem:[#allocation7 + $0xc4] ss:$16 sps:$4 sm:$0xff]  }
  0xe6   :  { %1375 = vmatprep.subr.bf16.mxu0 %v3571_v43  ;;  %1504 = vmatprep.subr.bf16.mxu1 %v3574_v44  ;;  %v3664_v43 = vld [vmem:[#allocation7 + $0xcc] ss:$16 sps:$4 sm:$0xff]   ;;  %v3659_v44 = vld [vmem:[#allocation7 + $0xc0] ss:$16 sps:$4 sm:$0xff]  }
  0xe9   :  { %1376 = vmatpush1.bf16.msra.mxu0 %v3569_v45  ;;  %1505 = vmatpush1.bf16.msra.mxu1 %v3572_v46  ;;  %v3662_v45 = vld [vmem:[#allocation7 + $0xc8] ss:$16 sps:$4 sm:$0xff]   ;;  %v3667_v46 = vld [vmem:[#allocation7 + $0xe4] ss:$16 sps:$4 sm:$0xff]  }
  0xea   :  { %1377 = vmatprep.subr.bf16.mxu0 %v3577_v47  ;;  %1506 = vmatprep.subr.bf16.mxu1 %v3580_v48  ;;  %v3670_v47 = vld [vmem:[#allocation7 + $0xec] ss:$16 sps:$4 sm:$0xff]   ;;  %v3665_v48 = vld [vmem:[#allocation7 + $0xe0] ss:$16 sps:$4 sm:$0xff]  }
  0xed   :  { %1378 = vmatpush1.bf16.msra.mxu0 %v3575_v49  ;;  %1507 = vmatpush1.bf16.msra.mxu1 %v3578_v50  ;;  %v3668_v49 = vld [vmem:[#allocation7 + $0xe8] ss:$16 sps:$4 sm:$0xff]   ;;  %v3673_v50 = vld [vmem:[#allocation7 + $0x104] ss:$16 sps:$4 sm:$0xff]  }
  0xee   :  { %1379 = vmatprep.subr.bf16.mxu0 %v3583_v51  ;;  %1508 = vmatprep.subr.bf16.mxu1 %v3586_v52  ;;  %v3676_v51 = vld [vmem:[#allocation7 + $0x10c] ss:$16 sps:$4 sm:$0xff]   ;;  %v3671_v52 = vld [vmem:[#allocation7 + $0x100] ss:$16 sps:$4 sm:$0xff]  }
  0xf1   :  { %1380 = vmatpush1.bf16.msra.mxu0 %v3581_v53  ;;  %1509 = vmatpush1.bf16.msra.mxu1 %v3584_v54  ;;  %v3674_v53 = vld [vmem:[#allocation7 + $0x108] ss:$16 sps:$4 sm:$0xff]   ;;  %v3679_v54 = vld [vmem:[#allocation7 + $0x124] ss:$16 sps:$4 sm:$0xff]  }
  0xf2   :  { %1381 = vmatprep.subr.bf16.mxu0 %v3589_v55  ;;  %1510 = vmatprep.subr.bf16.mxu1 %v3592_v56  ;;  %v3682_v55 = vld [vmem:[#allocation7 + $0x12c] ss:$16 sps:$4 sm:$0xff]   ;;  %v3677_v56 = vld [vmem:[#allocation7 + $0x120] ss:$16 sps:$4 sm:$0xff]  }
  0xf5   :  { %1382 = vmatpush1.bf16.msra.mxu0 %v3587_v57  ;;  %1511 = vmatpush1.bf16.msra.mxu1 %v3590_v58  ;;  %v3680_v57 = vld [vmem:[#allocation7 + $0x128] ss:$16 sps:$4 sm:$0xff]   ;;  %v3685_v58 = vld [vmem:[#allocation7 + $0x144] ss:$16 sps:$4 sm:$0xff]  }
  0xf6   :  { %1383 = vmatprep.subr.bf16.mxu0 %v3595_v59  ;;  %1512 = vmatprep.subr.bf16.mxu1 %v3598_v60  ;;  %v3688_v59 = vld [vmem:[#allocation7 + $0x14c] ss:$16 sps:$4 sm:$0xff]   ;;  %v3683_v60 = vld [vmem:[#allocation7 + $0x140] ss:$16 sps:$4 sm:$0xff]  }
  0xf9   :  { %1384 = vmatpush1.bf16.msra.mxu0 %v3593_v61  ;;  %1513 = vmatpush1.bf16.msra.mxu1 %v3596_v62  ;;  %v3686_v61 = vld [vmem:[#allocation7 + $0x148] ss:$16 sps:$4 sm:$0xff]   ;;  %v3691_v62 = vld [vmem:[#allocation7 + $0x164] ss:$16 sps:$4 sm:$0xff]  }
  0xfa   :  { %1385 = vmatprep.subr.bf16.mxu0 %v3601_v63  ;;  %1514 = vmatprep.subr.bf16.mxu1 %v3604_v0  ;;  %v3694_v63 = vld [vmem:[#allocation7 + $0x16c] ss:$16 sps:$4 sm:$0xff]   ;;  %v3689_v0 = vld [vmem:[#allocation7 + $0x160] ss:$16 sps:$4 sm:$0xff]  }
  0xfd   :  { %1386 = vmatpush1.bf16.msra.mxu0 %v3599_v1  ;;  %1515 = vmatpush1.bf16.msra.mxu1 %v3602_v2  ;;  %v3692_v1 = vld [vmem:[#allocation7 + $0x168] ss:$16 sps:$4 sm:$0xff]   ;;  %v3697_v2 = vld [vmem:[#allocation7 + $0x184] ss:$16 sps:$4 sm:$0xff]  }
  0xfe   :  { %1387 = vmatprep.subr.bf16.mxu0 %v3607_v3  ;;  %1516 = vmatprep.subr.bf16.mxu1 %v3610_v4  ;;  %v3700_v3 = vld [vmem:[#allocation7 + $0x18c] ss:$16 sps:$4 sm:$0xff]   ;;  %v3695_v4 = vld [vmem:[#allocation7 + $0x180] ss:$16 sps:$4 sm:$0xff]  }
 0x101   :  { %1388 = vmatpush1.bf16.msra.mxu0 %v3605_v5  ;;  %1517 = vmatpush1.bf16.msra.mxu1 %v3608_v6  ;;  %v3698_v5 = vld [vmem:[#allocation7 + $0x188] ss:$16 sps:$4 sm:$0xff]   ;;  %v3703_v6 = vld [vmem:[#allocation7 + $0x1a4] ss:$16 sps:$4 sm:$0xff]  }
 0x102   :  { %1389 = vmatprep.subr.bf16.mxu0 %v3613_v7  ;;  %1518 = vmatprep.subr.bf16.mxu1 %v3616_v8  ;;  %v3706_v7 = vld [vmem:[#allocation7 + $0x1ac] ss:$16 sps:$4 sm:$0xff]   ;;  %v3701_v8 = vld [vmem:[#allocation7 + $0x1a0] ss:$16 sps:$4 sm:$0xff]  }
 0x105   :  { %1390 = vmatpush1.bf16.msra.mxu0 %v3611_v9  ;;  %1519 = vmatpush1.bf16.msra.mxu1 %v3614_v10  ;;  %v3704_v9 = vld [vmem:[#allocation7 + $0x1a8] ss:$16 sps:$4 sm:$0xff]   ;;  %v3709_v10 = vld [vmem:[#allocation7 + $0x1c4] ss:$16 sps:$4 sm:$0xff]  }
 0x106   :  { %1391 = vmatprep.subr.bf16.mxu0 %v3619_v11  ;;  %1520 = vmatprep.subr.bf16.mxu1 %v3622_v12  ;;  %v3712_v11 = vld [vmem:[#allocation7 + $0x1cc] ss:$16 sps:$4 sm:$0xff]   ;;  %v3707_v12 = vld [vmem:[#allocation7 + $0x1c0] ss:$16 sps:$4 sm:$0xff]  }
 0x109   :  { %1392 = vmatpush1.bf16.msra.mxu0 %v3617_v13  ;;  %1521 = vmatpush1.bf16.msra.mxu1 %v3620_v14  ;;  %v3710_v13 = vld [vmem:[#allocation7 + $0x1c8] ss:$16 sps:$4 sm:$0xff]   ;;  %v3715_v14 = vld [vmem:[#allocation7 + $0x1e4] ss:$16 sps:$4 sm:$0xff]  }
 0x10a   :  { %2335 = vmatprep.subr.bf16.mxu0 %v3625_v17  ;;  %2421 = vmatprep.subr.bf16.mxu1 %v3628_v18  ;;  %v3716_v17 = vld [vmem:[#allocation7 + $0x1e8] ss:$16 sps:$4 sm:$0xff]   ;;  %v3721_v18 = vld [vmem:[#allocation7 + $0x204] ss:$16 sps:$4 sm:$0xff]  }
 0x10c   :  { %1394 = vmatmul.mubr.bf16.vlgmr.msra.gmra.mrb[0].mxu0 %v99_v21  ;;  %1523 = vmatmul.mubr.bf16.vlgmr.msra.gmra.mrb[0].mxu1 %v99_v21 }
 0x10d   :  { %2336 = vmatpush1.bf16.msra.mxu0 %v3623_v19  ;;  %2422 = vmatpush1.bf16.msra.mxu1 %v3626_v20  ;;  %v3724_v19 = vld [vmem:[#allocation7 + $0x20c] ss:$16 sps:$4 sm:$0xff]   ;;  %v295_v20 = vlaneseq }
 0x10e   :  { %2337 = vmatprep.subr.bf16.mxu0 %v3631_v22  ;;  %2423 = vmatprep.subr.bf16.mxu1 %v3634_v23 }
 0x10f   :  { %v4079_v21 = vshrl.u32 %v295_v20, 7  ;;  %v3758_v20 = vld [vmem:[#allocation7 + $0x2c8] ss:$16 sps:$4 sm:$0xff]  }
 0x111   :  { %2338 = vmatpush1.bf16.msra.mxu0 %v3629_v24  ;;  %2424 = vmatpush1.bf16.msra.mxu1 %v3632_v25  ;;  %v297_v22 = vsub.s32 0, %v4079_v21  ;;  %v305_v23 = vsub.s32 2, %v4079_v21  ;;  %v293_v24 = vld [vmem:[%s4128_s2] sm:$0xf]  ;;  %v301_v25 = vsub.s32 1, %v4079_v21 }
 0x112   :  { %2339 = vmatprep.subr.bf16.mxu0 %v3637_v26  ;;  %2425 = vmatprep.subr.bf16.mxu1 %v3640_v27  ;;  %v309_v26 = vsub.s32 3, %v4079_v21 }
 0x113   :  { %v298_v27 = vrot.slane %v293_v24, %v297_v22 }
 0x115   :  { %2340 = vmatpush1.bf16.msra.mxu0 %v3635_v28  ;;  %2426 = vmatpush1.bf16.msra.mxu1 %v3638_v29  ;;  %v306_v28 = vrot.slane %v293_v24, %v305_v23  ;;  %v302_v29 = vrot.slane %v293_v24, %v301_v25 }
 0x116   :  { %2341 = vmatprep.subr.bf16.mxu0 %v3643_v30  ;;  %2427 = vmatprep.subr.bf16.mxu1 %v3646_v31  ;;  %v310_v30 = vrot.slane %v293_v24, %v309_v26  ;;  %v3763_v24 = vld [vmem:[#allocation7 + $0x2e4] ss:$16 sps:$4 sm:$0xff]  }
 0x119   :  { %2342 = vmatpush1.bf16.msra.mxu0 %v3641_v32  ;;  %2428 = vmatpush1.bf16.msra.mxu1 %v3644_v33 }
 0x11a   :  { %2343 = vmatprep.subr.bf16.mxu0 %v3649_v34  ;;  %2429 = vmatprep.subr.bf16.mxu1 %v3652_v35 }
 0x11d   :  { %2344 = vmatpush1.bf16.msra.mxu0 %v3647_v36  ;;  %2430 = vmatpush1.bf16.msra.mxu1 %v3650_v37 }
 0x11e   :  { %2345 = vmatprep.subr.bf16.mxu0 %v3655_v38  ;;  %2431 = vmatprep.subr.bf16.mxu1 %v3658_v39 }
 0x121   :  { %2346 = vmatpush1.bf16.msra.mxu0 %v3653_v40  ;;  %2432 = vmatpush1.bf16.msra.mxu1 %v3656_v41 }
 0x122   :  { %2347 = vmatprep.subr.bf16.mxu0 %v3661_v42  ;;  %2433 = vmatprep.subr.bf16.mxu1 %v3664_v43 }
 0x125   :  { %2348 = vmatpush1.bf16.msra.mxu0 %v3659_v44  ;;  %2434 = vmatpush1.bf16.msra.mxu1 %v3662_v45 }
 0x126   :  { %2349 = vmatprep.subr.bf16.mxu0 %v3667_v46  ;;  %2435 = vmatprep.subr.bf16.mxu1 %v3670_v47 }
 0x129   :  { %2350 = vmatpush1.bf16.msra.mxu0 %v3665_v48  ;;  %2436 = vmatpush1.bf16.msra.mxu1 %v3668_v49 }
 0x12a   :  { %2351 = vmatprep.subr.bf16.mxu0 %v3673_v50  ;;  %2437 = vmatprep.subr.bf16.mxu1 %v3676_v51 }
 0x12d   :  { %2352 = vmatpush1.bf16.msra.mxu0 %v3671_v52  ;;  %2438 = vmatpush1.bf16.msra.mxu1 %v3674_v53 }
 0x12e   :  { %2353 = vmatprep.subr.bf16.mxu0 %v3679_v54  ;;  %2439 = vmatprep.subr.bf16.mxu1 %v3682_v55 }
 0x131   :  { %2354 = vmatpush1.bf16.msra.mxu0 %v3677_v56  ;;  %2440 = vmatpush1.bf16.msra.mxu1 %v3680_v57 }
 0x132   :  { %2355 = vmatprep.subr.bf16.mxu0 %v3685_v58  ;;  %2441 = vmatprep.subr.bf16.mxu1 %v3688_v59  ;;  %v3719_v59 = vld [vmem:[#allocation7 + $0x200] ss:$16 sps:$4 sm:$0xff]  }
 0x135   :  { %2356 = vmatpush1.bf16.msra.mxu0 %v3683_v60  ;;  %2442 = vmatpush1.bf16.msra.mxu1 %v3686_v61  ;;  %v3722_v60 = vld [vmem:[#allocation7 + $0x208] ss:$16 sps:$4 sm:$0xff]   ;;  %v3727_v61 = vld [vmem:[#allocation7 + $0x224] ss:$16 sps:$4 sm:$0xff]  }
 0x136   :  { %2357 = vmatprep.subr.bf16.mxu0 %v3691_v62  ;;  %2443 = vmatprep.subr.bf16.mxu1 %v3694_v63  ;;  %v3730_v62 = vld [vmem:[#allocation7 + $0x22c] ss:$16 sps:$4 sm:$0xff]   ;;  %v3725_v63 = vld [vmem:[#allocation7 + $0x220] ss:$16 sps:$4 sm:$0xff]  }
 0x139   :  { %2358 = vmatpush1.bf16.msra.mxu0 %v3689_v0  ;;  %2444 = vmatpush1.bf16.msra.mxu1 %v3692_v1  ;;  %v3728_v0 = vld [vmem:[#allocation7 + $0x228] ss:$16 sps:$4 sm:$0xff]   ;;  %v3733_v1 = vld [vmem:[#allocation7 + $0x244] ss:$16 sps:$4 sm:$0xff]  }
 0x13a   :  { %2359 = vmatprep.subr.bf16.mxu0 %v3697_v2  ;;  %2445 = vmatprep.subr.bf16.mxu1 %v3700_v3  ;;  %v3736_v2 = vld [vmem:[#allocation7 + $0x24c] ss:$16 sps:$4 sm:$0xff]   ;;  %v3731_v3 = vld [vmem:[#allocation7 + $0x240] ss:$16 sps:$4 sm:$0xff]  }
 0x13d   :  { %2360 = vmatpush1.bf16.msra.mxu0 %v3695_v4  ;;  %2446 = vmatpush1.bf16.msra.mxu1 %v3698_v5  ;;  %v3734_v4 = vld [vmem:[#allocation7 + $0x248] ss:$16 sps:$4 sm:$0xff]   ;;  %v3739_v5 = vld [vmem:[#allocation7 + $0x264] ss:$16 sps:$4 sm:$0xff]  }
 0x13e   :  { %2361 = vmatprep.subr.bf16.mxu0 %v3703_v6  ;;  %2447 = vmatprep.subr.bf16.mxu1 %v3706_v7  ;;  %v3742_v6 = vld [vmem:[#allocation7 + $0x26c] ss:$16 sps:$4 sm:$0xff]   ;;  %v3737_v7 = vld [vmem:[#allocation7 + $0x260] ss:$16 sps:$4 sm:$0xff]  }
 0x141   :  { %2362 = vmatpush1.bf16.msra.mxu0 %v3701_v8  ;;  %2448 = vmatpush1.bf16.msra.mxu1 %v3704_v9  ;;  %v3740_v8 = vld [vmem:[#allocation7 + $0x268] ss:$16 sps:$4 sm:$0xff]   ;;  %v3745_v9 = vld [vmem:[#allocation7 + $0x284] ss:$16 sps:$4 sm:$0xff]  }
 0x142   :  { %2363 = vmatprep.subr.bf16.mxu0 %v3709_v10  ;;  %2449 = vmatprep.subr.bf16.mxu1 %v3712_v11  ;;  %v3748_v10 = vld [vmem:[#allocation7 + $0x28c] ss:$16 sps:$4 sm:$0xff]   ;;  %v3743_v11 = vld [vmem:[#allocation7 + $0x280] ss:$16 sps:$4 sm:$0xff]  }
 0x145   :  { %2364 = vmatpush1.bf16.msra.mxu0 %v3707_v12  ;;  %2450 = vmatpush1.bf16.msra.mxu1 %v3710_v13  ;;  %v3746_v12 = vld [vmem:[#allocation7 + $0x288] ss:$16 sps:$4 sm:$0xff]   ;;  %v3751_v13 = vld [vmem:[#allocation7 + $0x2a4] ss:$16 sps:$4 sm:$0xff]  }
 0x146   :  { %2365 = vmatprep.subr.bf16.mxu0 %v3715_v14  ;;  %2451 = vmatprep.subr.bf16.mxu1 %v3718_v15  ;;  %v3754_v14 = vld [vmem:[#allocation7 + $0x2ac] ss:$16 sps:$4 sm:$0xff]   ;;  %v3749_v15 = vld [vmem:[#allocation7 + $0x2a0] ss:$16 sps:$4 sm:$0xff]  }
 0x149   :  { %2366 = vmatpush1.bf16.msra.mxu0 %v3713_v16  ;;  %2452 = vmatpush1.bf16.msra.mxu1 %v3716_v17  ;;  %v3752_v16 = vld [vmem:[#allocation7 + $0x2a8] ss:$16 sps:$4 sm:$0xff]   ;;  %v3757_v17 = vld [vmem:[#allocation7 + $0x2c4] ss:$16 sps:$4 sm:$0xff]  }
 0x14a   :  { %2378 = vmatprep.subr.bf16.mxu0 %v3721_v18  ;;  %2464 = vmatprep.subr.bf16.mxu1 %v3724_v19  ;;  %v3760_v18 = vld [vmem:[#allocation7 + $0x2cc] ss:$16 sps:$4 sm:$0xff]   ;;  %v3755_v19 = vld [vmem:[#allocation7 + $0x2c0] ss:$16 sps:$4 sm:$0xff]  }
 0x1df   :  { %v1395_v31 = vpop.f32.mrb[0].mxu0  ;;  %v1524_v32 = vpop.f32.mrb[0].mxu1 }
 0x1e0   :  { %v3282_v33 = vadd.f32 %v1395_v31, %v298_v27  ;;  %v3286_v34 = vadd.f32 %v1524_v32, %v306_v28  ;;  %v1397_v35 = vpop.f32.mrb[1].mxu0  ;;  %v1526_v36 = vpop.f32.mrb[1].mxu1  ;;  %v3772_v31 = vld [vmem:[#allocation7 + $0x30c] ss:$16 sps:$4 sm:$0xff]   ;;  %v3767_v32 = vld [vmem:[#allocation7 + $0x300] ss:$16 sps:$4 sm:$0xff]  }
 0x1e1   :  { %v3283_v37 = vadd.f32 %v1397_v35, %v302_v29  ;;  %v3287_v38 = vadd.f32 %v1526_v36, %v310_v30  ;;  %v1399_v39 = vpop.f32.mrb[2].mxu0  ;;  %v1528_v40 = vpop.f32.mrb[2].mxu1  ;;  %v3778_v35 = vld [vmem:[#allocation7 + $0x32c] ss:$16 sps:$4 sm:$0xff]   ;;  %v3773_v36 = vld [vmem:[#allocation7 + $0x320] ss:$16 sps:$4 sm:$0xff]  }
 0x1e2   :  { %v3284_v41 = vadd.f32 %v1399_v39, %v298_v27  ;;  %v3288_v42 = vadd.f32 %v1528_v40, %v306_v28  ;;  %v1401_v43 = vpop.f32.mrb[3].mxu0  ;;  %v1530_v44 = vpop.f32.mrb[3].mxu1  ;;  %v1533_v47 = vmax.f32 %v3282_v33, 0.0  ;;  %v1535_v48 = vmax.f32 %v3286_v34, 0.0  ;;  %v3766_v27 = vld [vmem:[#allocation7 + $0x2ec] ss:$16 sps:$4 sm:$0xff]  }
 0x1e3   :  { %v3285_v45 = vadd.f32 %v1401_v43, %v302_v29  ;;  %v3289_v46 = vadd.f32 %v1530_v44, %v310_v30  ;;  %v1534_v51 = vmax.f32 %v3283_v37, 0.0  ;;  %v1536_v52 = vmax.f32 %v3287_v38, 0.0  ;;  %v3761_v28 = vld [vmem:[#allocation7 + $0x2e0] ss:$16 sps:$4 sm:$0xff]   ;;  %v3764_v29 = vld [vmem:[#allocation7 + $0x2e8] ss:$16 sps:$4 sm:$0xff]  }
 0x1e4   :  { %v1537_v49 = vmax.f32 %v3284_v41, 0.0  ;;  %v1539_v50 = vmax.f32 %v3288_v42, 0.0  ;;  %v3769_v30 = vld [vmem:[#allocation7 + $0x304] ss:$16 sps:$4 sm:$0xff]   ;;  %v3770_v33 = vld [vmem:[#allocation7 + $0x308] ss:$16 sps:$4 sm:$0xff]  }
 0x1e5   :  { %v1538_v53 = vmax.f32 %v3285_v45, 0.0  ;;  %v1540_v54 = vmax.f32 %v3289_v46, 0.0  ;;  %v3775_v34 = vld [vmem:[#allocation7 + $0x324] ss:$16 sps:$4 sm:$0xff]   ;;  %v3776_v37 = vld [vmem:[#allocation7 + $0x328] ss:$16 sps:$4 sm:$0xff]  }
 0x1e6   :  { %v1541_v55 = vpack.c.bf16 %v1537_v49, %v1533_v47  ;;  %v4096_v56 = vpack.c.bf16 %v1539_v50, %v1535_v48  ;;  %v3781_v38 = vld [vmem:[#allocation7 + $0x344] ss:$16 sps:$4 sm:$0xff]   ;;  %v3784_v39 = vld [vmem:[#allocation7 + $0x34c] ss:$16 sps:$4 sm:$0xff]   ;;  %v3779_v40 = vld [vmem:[#allocation7 + $0x340] ss:$16 sps:$4 sm:$0xff]  }
 0x1e7   :  { %v1542_v57 = vpack.c.bf16 %v1538_v53, %v1534_v51  ;;  %v1544_v58 = vpack.c.bf16 %v1540_v54, %v1536_v52  ;;  %v3782_v41 = vld [vmem:[#allocation7 + $0x348] ss:$16 sps:$4 sm:$0xff]   ;;  %v3787_v42 = vld [vmem:[#allocation7 + $0x364] ss:$16 sps:$4 sm:$0xff]   ;;  %v3790_v43 = vld [vmem:[#allocation7 + $0x36c] ss:$16 sps:$4 sm:$0xff]  }
 0x1e8   :  { %v3785_v44 = vld [vmem:[#allocation7 + $0x360] ss:$16 sps:$4 sm:$0xff]   ;;  %v3788_v45 = vld [vmem:[#allocation7 + $0x368] ss:$16 sps:$4 sm:$0xff]   ;;  %v3793_v46 = vld [vmem:[#allocation7 + $0x384] ss:$16 sps:$4 sm:$0xff]  }
 0x1e9   :  { %2367 = vmatprep.mubr.bf16.mxu0 %v1542_v57  ;;  %2453 = vmatprep.mubr.bf16.mxu1 %v1542_v57  ;;  %v3796_v47 = vld [vmem:[#allocation7 + $0x38c] ss:$16 sps:$4 sm:$0xff]   ;;  %v3791_v48 = vld [vmem:[#allocation7 + $0x380] ss:$16 sps:$4 sm:$0xff]   ;;  %v3794_v49 = vld [vmem:[#allocation7 + $0x388] ss:$16 sps:$4 sm:$0xff]  }
 0x1ea   :  { %2368 = vmatmul.mubr.bf16.vlgmr.msra.gmra.mrb[4].mxu0 %v1541_v55  ;;  %2454 = vmatmul.mubr.bf16.vlgmr.msra.gmra.mrb[4].mxu1 %v1541_v55  ;;  %v3799_v50 = vld [vmem:[#allocation7 + $0x3a4] ss:$16 sps:$4 sm:$0xff]   ;;  %v3802_v51 = vld [vmem:[#allocation7 + $0x3ac] ss:$16 sps:$4 sm:$0xff]   ;;  %v3797_v52 = vld [vmem:[#allocation7 + $0x3a0] ss:$16 sps:$4 sm:$0xff]  }
 0x1eb   :  { %2379 = vmatpush1.bf16.msra.mxu0 %v3719_v59  ;;  %2465 = vmatpush1.bf16.msra.mxu1 %v3722_v60  ;;  %v3800_v53 = vld [vmem:[#allocation7 + $0x3a8] ss:$16 sps:$4 sm:$0xff]   ;;  %v3805_v54 = vld [vmem:[#allocation7 + $0x3c4] ss:$16 sps:$4 sm:$0xff]   ;;  %v3808_v55 = vld [vmem:[#allocation7 + $0x3cc] ss:$16 sps:$4 sm:$0xff]  }
 0x1ec   :  { %2410 = vmatprep.mubr.bf16.mxu0 %v1544_v58  ;;  %2496 = vmatprep.mubr.bf16.mxu1 %v1544_v58  ;;  %v3803_v57 = vld [vmem:[#allocation7 + $0x3c0] ss:$16 sps:$4 sm:$0xff]   ;;  %v3806_v58 = vld [vmem:[#allocation7 + $0x3c8] ss:$16 sps:$4 sm:$0xff]   ;;  %v3811_v59 = vld [vmem:[#allocation7 + $0x3e4] ss:$16 sps:$4 sm:$0xff]  }
 0x1ed   :  { %2380 = vmatprep.subr.bf16.mxu0 %v3727_v61  ;;  %2466 = vmatprep.subr.bf16.mxu1 %v3730_v62  ;;  %v3814_v60 = vld [vmem:[#allocation7 + $0x3ec] ss:$16 sps:$4 sm:$0xff]   ;;  %v3809_v61 = vld [vmem:[#allocation7 + $0x3e0] ss:$16 sps:$4 sm:$0xff]   ;;  %v3812_v62 = vld [vmem:[#allocation7 + $0x3e8] ss:$16 sps:$4 sm:$0xff]  }
 0x1ef   :  { %2381 = vmatpush1.bf16.msra.mxu0 %v3725_v63  ;;  %2467 = vmatpush1.bf16.msra.mxu1 %v3728_v0  ;;  %v3815_v63 = vld [vmem:[#allocation8 + $0x40] sm:$0xff]  }
 0x1f0   :  { %2382 = vmatprep.subr.bf16.mxu0 %v3733_v1  ;;  %2468 = vmatprep.subr.bf16.mxu1 %v3736_v2  ;;  %v3816_v0 = vld [vmem:[#allocation8 + $0xc0] sm:$0xff]  }
 0x1f1   :  { %v3817_v1 = vld [vmem:[#allocation8] sm:$0xff]  }
 0x1f2   :  { %v3818_v2 = vld [vmem:[#allocation8 + $0x80] sm:$0xff]  }
 0x1f3   :  { %2383 = vmatpush1.bf16.msra.mxu0 %v3731_v3  ;;  %2469 = vmatpush1.bf16.msra.mxu1 %v3734_v4  ;;  %v3819_v3 = vld [vmem:[#allocation8 + $0x48] sm:$0xff]  }
 0x1f4   :  { %2384 = vmatprep.subr.bf16.mxu0 %v3739_v5  ;;  %2470 = vmatprep.subr.bf16.mxu1 %v3742_v6  ;;  %v3820_v4 = vld [vmem:[#allocation8 + $0xc8] sm:$0xff]  }
 0x1f5   :  { %v3821_v5 = vld [vmem:[#allocation8 + $0x8] sm:$0xff]  }
 0x1f6   :  { %v3822_v6 = vld [vmem:[#allocation8 + $0x88] sm:$0xff]  }
 0x1f7   :  { %2385 = vmatpush1.bf16.msra.mxu0 %v3737_v7  ;;  %2471 = vmatpush1.bf16.msra.mxu1 %v3740_v8  ;;  %v3823_v7 = vld [vmem:[#allocation8 + $0x50] sm:$0xff]  }
 0x1f8   :  { %2386 = vmatprep.subr.bf16.mxu0 %v3745_v9  ;;  %2472 = vmatprep.subr.bf16.mxu1 %v3748_v10  ;;  %v3824_v8 = vld [vmem:[#allocation8 + $0xd0] sm:$0xff]  }
 0x1f9   :  { %v3825_v9 = vld [vmem:[#allocation8 + $0x10] sm:$0xff]  }
 0x1fa   :  { %v3826_v10 = vld [vmem:[#allocation8 + $0x90] sm:$0xff]  }
 0x1fb   :  { %2387 = vmatpush1.bf16.msra.mxu0 %v3743_v11  ;;  %2473 = vmatpush1.bf16.msra.mxu1 %v3746_v12  ;;  %v3827_v11 = vld [vmem:[#allocation8 + $0x58] sm:$0xff]  }
 0x1fc   :  { %2388 = vmatprep.subr.bf16.mxu0 %v3751_v13  ;;  %2474 = vmatprep.subr.bf16.mxu1 %v3754_v14  ;;  %v3828_v12 = vld [vmem:[#allocation8 + $0xd8] sm:$0xff]   ;;  %v3831_v14 = vld [vmem:[#allocation8 + $0x60] sm:$0xff]  }
 0x1fd   :  { %v3829_v13 = vld [vmem:[#allocation8 + $0x18] sm:$0xff]  }
 0x1ff   :  { %2389 = vmatpush1.bf16.msra.mxu0 %v3749_v15  ;;  %2475 = vmatpush1.bf16.msra.mxu1 %v3752_v16  ;;  %v3832_v15 = vld [vmem:[#allocation8 + $0xe0] sm:$0xff]  }
 0x200   :  { %2390 = vmatprep.subr.bf16.mxu0 %v3757_v17  ;;  %2476 = vmatprep.subr.bf16.mxu1 %v3760_v18  ;;  %v3833_v16 = vld [vmem:[#allocation8 + $0x20] sm:$0xff]   ;;  %v3835_v18 = vld [vmem:[#allocation8 + $0x68] sm:$0xff]  }
 0x201   :  { %v3834_v17 = vld [vmem:[#allocation8 + $0xa0] sm:$0xff]  }
 0x203   :  { %2391 = vmatpush1.bf16.msra.mxu0 %v3755_v19  ;;  %2477 = vmatpush1.bf16.msra.mxu1 %v3758_v20  ;;  %v3836_v19 = vld [vmem:[#allocation8 + $0xe8] sm:$0xff]  }
 0x204   :  { %2392 = vmatprep.subr.bf16.mxu0 %v3763_v24  ;;  %2478 = vmatprep.subr.bf16.mxu1 %v3766_v27  ;;  %v3837_v20 = vld [vmem:[#allocation8 + $0x28] sm:$0xff]   ;;  %v3839_v27 = vld [vmem:[#allocation8 + $0x70] sm:$0xff]  }
 0x205   :  { %v3838_v24 = vld [vmem:[#allocation8 + $0xa8] sm:$0xff]  }
 0x207   :  { %2393 = vmatpush1.bf16.msra.mxu0 %v3761_v28  ;;  %2479 = vmatpush1.bf16.msra.mxu1 %v3764_v29  ;;  %v3840_v28 = vld [vmem:[#allocation8 + $0xf0] sm:$0xff]  }
 0x208   :  { %2394 = vmatprep.subr.bf16.mxu0 %v3769_v30  ;;  %2480 = vmatprep.subr.bf16.mxu1 %v3772_v31  ;;  %v3841_v29 = vld [vmem:[#allocation8 + $0x30] sm:$0xff]   ;;  %v3843_v31 = vld [vmem:[#allocation8 + $0x78] sm:$0xff]  }
 0x209   :  { %v3842_v30 = vld [vmem:[#allocation8 + $0xb0] sm:$0xff]  }
 0x20b   :  { %2395 = vmatpush1.bf16.msra.mxu0 %v3767_v32  ;;  %2481 = vmatpush1.bf16.msra.mxu1 %v3770_v33  ;;  %v3844_v32 = vld [vmem:[#allocation8 + $0xf8] sm:$0xff]  }
 0x20c   :  { %2396 = vmatprep.subr.bf16.mxu0 %v3775_v34  ;;  %2482 = vmatprep.subr.bf16.mxu1 %v3778_v35  ;;  %v3845_v33 = vld [vmem:[#allocation8 + $0x38] sm:$0xff]   ;;  %v1673_v35 = vld [vmem:[%s4130_s4] sm:$0xf] }
 0x20d   :  { %v3846_v34 = vld [vmem:[#allocation8 + $0xb8] sm:$0xff]  }
 0x20f   :  { %2397 = vmatpush1.bf16.msra.mxu0 %v3773_v36  ;;  %2483 = vmatpush1.bf16.msra.mxu1 %v3776_v37  ;;  %v1678_v36 = vrot.slane %v1673_v35, %v297_v22  ;;  %v1686_v37 = vrot.slane %v1673_v35, %v305_v23 }
 0x210   :  { %2398 = vmatprep.subr.bf16.mxu0 %v3781_v38  ;;  %2484 = vmatprep.subr.bf16.mxu1 %v3784_v39  ;;  %v1682_v38 = vrot.slane %v1673_v35, %v301_v25  ;;  %v1690_v39 = vrot.slane %v1673_v35, %v309_v26 }
 0x213   :  { %2399 = vmatpush1.bf16.msra.mxu0 %v3779_v40  ;;  %2485 = vmatpush1.bf16.msra.mxu1 %v3782_v41 }
 0x214   :  { %2400 = vmatprep.subr.bf16.mxu0 %v3787_v42  ;;  %2486 = vmatprep.subr.bf16.mxu1 %v3790_v43 }
 0x217   :  { %2401 = vmatpush1.bf16.msra.mxu0 %v3785_v44  ;;  %2487 = vmatpush1.bf16.msra.mxu1 %v3788_v45 }
 0x218   :  { %2402 = vmatprep.subr.bf16.mxu0 %v3793_v46  ;;  %2488 = vmatprep.subr.bf16.mxu1 %v3796_v47 }
 0x21b   :  { %2403 = vmatpush1.bf16.msra.mxu0 %v3791_v48  ;;  %2489 = vmatpush1.bf16.msra.mxu1 %v3794_v49 }
 0x21c   :  { %2404 = vmatprep.subr.bf16.mxu0 %v3799_v50  ;;  %2490 = vmatprep.subr.bf16.mxu1 %v3802_v51 }
 0x21f   :  { %2405 = vmatpush1.bf16.msra.mxu0 %v3797_v52  ;;  %2491 = vmatpush1.bf16.msra.mxu1 %v3800_v53 }
 0x220   :  { %2406 = vmatprep.subr.bf16.mxu0 %v3805_v54  ;;  %2492 = vmatprep.subr.bf16.mxu1 %v3808_v55 }
 0x223   :  { %2407 = vmatpush1.bf16.msra.mxu0 %v3803_v57  ;;  %2493 = vmatpush1.bf16.msra.mxu1 %v3806_v58 }
 0x224   :  { %2408 = vmatprep.subr.bf16.mxu0 %v3811_v59  ;;  %2494 = vmatprep.subr.bf16.mxu1 %v3814_v60 }
 0x227   :  { %2409 = vmatpush1.bf16.msra.mxu0 %v3809_v61  ;;  %2495 = vmatpush1.bf16.msra.mxu1 %v3812_v62 }
 0x228   :  { %3238 = vmatprep.subr.bf16.mxu0 %v3815_v63  ;;  %3260 = vmatprep.subr.bf16.mxu1 %v3816_v0 }
 0x22a   :  { %2411 = vmatmul.mubr.bf16.vlgmr.msra.gmra.mrb[4].mxu0 %v4096_v56  ;;  %2497 = vmatmul.mubr.bf16.vlgmr.msra.gmra.mrb[4].mxu1 %v4096_v56  ;;  %v3830_v56 = vld [vmem:[#allocation8 + $0x98] sm:$0xff]  }
 0x22b   :  { %3239 = vmatpush3.bf16.msra.mxu0 %v3817_v1  ;;  %3261 = vmatpush3.bf16.msra.mxu1 %v3818_v2  ;;  %v3205_v2 = vld [vmem:[%s4132_s6] ss:$0 sm:$0xff]  ;;  %s3935_s6 = scalar_lea.vmem %s2872_s9, 256 }
 0x22c   :  { %3240 = vmatprep.subr.bf16.mxu0 %v3819_v3  ;;  %3262 = vmatprep.subr.bf16.mxu1 %v3820_v4  ;;  %p3936_p4 = scmp.ne.s32.totalorder %s2872_s9, %s3935_s6  ;;  %p3941_p6 = scmp.lt.s32.totalorder %s3935_s6, %s3935_s6 }
 0x22e   :  { %p3942_p7 = por %p3941_p6, %p3940_p5 }
 0x22f   :  { %3241 = vmatpush3.bf16.msra.mxu0 %v3821_v5  ;;  %3263 = vmatpush3.bf16.msra.mxu1 %v3822_v6 }
 0x230   :  { %3242 = vmatprep.subr.bf16.mxu0 %v3823_v7  ;;  %3264 = vmatprep.subr.bf16.mxu1 %v3824_v8  ;;  %p3943_p8 = pnand %p3942_p7, %p3936_p4 }
 0x233   :  { %3243 = vmatpush3.bf16.msra.mxu0 %v3825_v9  ;;  %3265 = vmatpush3.bf16.msra.mxu1 %v3826_v10 }
 0x234   :  { %3244 = vmatprep.subr.bf16.mxu0 %v3827_v11  ;;  %3266 = vmatprep.subr.bf16.mxu1 %v3828_v12 }
 0x237   :  { %3245 = vmatpush3.bf16.msra.mxu0 %v3829_v13  ;;  %3267 = vmatpush3.bf16.msra.mxu1 %v3830_v56 }
 0x238   :  { %3246 = vmatprep.subr.bf16.mxu0 %v3831_v14  ;;  %3268 = vmatprep.subr.bf16.mxu1 %v3832_v15 }
 0x23b   :  { %3247 = vmatpush3.bf16.msra.mxu0 %v3833_v16  ;;  %3269 = vmatpush3.bf16.msra.mxu1 %v3834_v17 }
 0x23c   :  { %3248 = vmatprep.subr.bf16.mxu0 %v3835_v18  ;;  %3270 = vmatprep.subr.bf16.mxu1 %v3836_v19 }
 0x23f   :  { %3249 = vmatpush3.bf16.msra.mxu0 %v3837_v20  ;;  %3271 = vmatpush3.bf16.msra.mxu1 %v3838_v24 }
 0x240   :  { %3250 = vmatprep.subr.bf16.mxu0 %v3839_v27  ;;  %3272 = vmatprep.subr.bf16.mxu1 %v3840_v28 }
 0x243   :  { %3251 = vmatpush3.bf16.msra.mxu0 %v3841_v29  ;;  %3273 = vmatpush3.bf16.msra.mxu1 %v3842_v30 }
 0x244   :  { %3252 = vmatprep.subr.bf16.mxu0 %v3843_v31  ;;  %3274 = vmatprep.subr.bf16.mxu1 %v3844_v32 }
 0x247   :  { %3253 = vmatpush3.bf16.msra.mxu0 %v3845_v33  ;;  %3275 = vmatpush3.bf16.msra.mxu1 %v3846_v34 }
 0x2fd   :  { %v2412_v40 = vpop.f32.mrb[4].mxu0  ;;  %v2498_v41 = vpop.f32.mrb[4].mxu1 }
 0x2fe   :  { %v3290_v42 = vadd.f32 %v2412_v40, %v1678_v36  ;;  %v3294_v43 = vadd.f32 %v2498_v41, %v1686_v37  ;;  %v2414_v44 = vpop.f32.mrb[5].mxu0  ;;  %v2500_v45 = vpop.f32.mrb[5].mxu1 }
 0x2ff   :  { %v3291_v46 = vadd.f32 %v2414_v44, %v1682_v38  ;;  %v3295_v47 = vadd.f32 %v2500_v45, %v1690_v39  ;;  %v2416_v48 = vpop.f32.mrb[6].mxu0  ;;  %v2502_v49 = vpop.f32.mrb[6].mxu1 }
 0x300   :  { %v3292_v22 = vadd.f32 %v2416_v48, %v1678_v36  ;;  %v3296_v50 = vadd.f32 %v2502_v49, %v1686_v37  ;;  %v2418_v51 = vpop.f32.mrb[7].mxu0  ;;  %v2504_v23 = vpop.f32.mrb[7].mxu1  ;;  %v2507_v25 = vmax.f32 %v3290_v42, 0.0  ;;  %v2509_v54 = vmax.f32 %v3294_v43, 0.0 }
 0x301   :  { %v3293_v52 = vadd.f32 %v2418_v51, %v1682_v38  ;;  %v3297_v53 = vadd.f32 %v2504_v23, %v1690_v39  ;;  %v2508_v55 = vmax.f32 %v3291_v46, 0.0  ;;  %v2510_v57 = vmax.f32 %v3295_v47, 0.0 }
 0x302   :  { %v2511_v21 = vmax.f32 %v3292_v22, 0.0  ;;  %v2513_v26 = vmax.f32 %v3296_v50, 0.0 }
 0x303   :  { %v2512_v58 = vmax.f32 %v3293_v52, 0.0  ;;  %v2514_v59 = vmax.f32 %v3297_v53, 0.0 }
 0x304   :  { %v2515_v60 = vpack.c.bf16 %v2511_v21, %v2507_v25  ;;  %v2517_v61 = vpack.c.bf16 %v2513_v26, %v2509_v54 }
 0x305   :  { %v2516_v62 = vpack.c.bf16 %v2512_v58, %v2508_v55  ;;  %v2518_v63 = vpack.c.bf16 %v2514_v59, %v2510_v57 }
 0x307   :  { %2814 = vmatprep.mubr.bf16.mxu0 %v2516_v62  ;;  %2855 = vmatprep.mubr.bf16.mxu1 %v2518_v63 }
 0x308   :  { %2815 = vmatmul.mubr.bf16.vlgmr.msra.gmra.mrb[8].mxu0 %v2515_v60  ;;  %2856 = vmatmul.mubr.bf16.vlgmr.msra.gmra.mrb[8].mxu1 %v2517_v61 }
 0x3db   :  { %v3254_v0 = vpop.f32.mrb[8].mxu0  ;;  %v3276_v1 = vpop.f32.mrb[8].mxu1 }
 0x3dc   :  { %v3255_v3 = vpop.f32.mrb[9].mxu0  ;;  %v3277_v4 = vpop.f32.mrb[9].mxu1 }
 0x3dd   :  { %v3256_v5 = vadd.f32 %v3255_v3, %v3254_v0  ;;  %v3278_v6 = vadd.f32 %v3277_v4, %v3276_v1  ;;  %v3257_v7 = vpop.f32.mrb[10].mxu0  ;;  %v3279_v8 = vpop.f32.mrb[10].mxu1 }
 0x3de   :  { %v3258_v9 = vpop.f32.mrb[11].mxu0  ;;  %v3280_v10 = vpop.f32.mrb[11].mxu1 }
 0x3df   :  { %v2817_v11 = vadd.f32 %v3256_v5, %v3205_v2  ;;  %v3259_v12 = vadd.f32 %v3258_v9, %v3257_v7  ;;  %v3281_v13 = vadd.f32 %v3280_v10, %v3279_v8 }
 0x3e1   :  { %v2858_v56 = vadd.f32 %v3278_v6, %v2817_v11  ;;  %v2820_v14 = vadd.f32 %v3259_v12, %v3205_v2 }
 0x3e3   :  { %2864 = vst [vmem:[#allocation10] sm:$0xff] %v2858_v56  ;;  %v2861_v15 = vadd.f32 %v3281_v13, %v2820_v14 }
 0x3e5   :  { %2865 = vst [vmem:[#allocation10 + $0x8] sm:$0xff] %v2861_v15 }
 0x3e6   :  { %3946 = shalt.err (!%p3943_p8)
}
 0x3e7   :  { %s3947_s14 = scalar_lea.hbm %s4133_s7, 256 }
 0x3e8   :  { %p3948_p9 = scmp.ne.s32.totalorder %s4133_s7, %s3947_s14  ;;  %p3951_p10 = scmp.lt.u32.totalorder %s3947_s14, %s4133_s7 }
 0x3ea   :  { %p3953_p11 = pnand %p3951_p10, %p3948_p9 }
 0x3ec   :  { %3956 = shalt.err (!%p3953_p11)
}
 0x3ed   :  { %s3976_s16 = smov 128   ;;  %s3977_s19 = smov 8  }
 0x3ee   :  { %2877 = dma.vmem_to_hbm [thread:$0]  %s2872_s9, 256, %s4133_s7, [#allocation4], %s3976_s16, %s3976_s16, %s3977_s19  }
 0x3ef   :  { %3963 = dma.done.wait [#allocation4], 256  }
 0x3f0   :  { %3964 = vsyncadd [#allocation4], 4294967040 }
 0x3f1   :  { %2881 = vsyncpa [#allocation3], 1 }
 0x3f2   :  { %2882 = vsyncpa [#allocation6], 1 }
 0x3f3   :  { %2883 = vsyncpa [#allocation9], 1 }
 0x3f4   :  { %2884 = vsyncpa [#allocation4], 1 }

</bundles_post_ra>
